<compile_context>
chip_gen: v7x
topology: tpu7x:2x2x1
jax: 0.10.0
libtpu: 0.0.40
codegen_flags: <defaults>
</compile_context>

<pallas_src>
import jax
import jax.numpy as jnp
from jax.experimental import pallas as pl
from jax.experimental.pallas import tpu as pltpu


# ---------------------------------------------------------------------------
# Fused kernel: insert-prompt -> encoder layer -> pooling + mask gather.
# ---------------------------------------------------------------------------
def make_fused_kernel(B, S, H, F, P, use_prompt, pooling):
    T = S + P if use_prompt else S
    BT = B * T

    def kernel(sep_ref, loc_ref, raw_ref, prompt_ref, bias_ref,
               wq_ref, wk_ref, wv_ref, wo_ref, w1_ref, w2_ref,
               g1_ref, b1_ref, g2_ref, b2_ref,
               hidden_ref, mask_ref, last_ref):
        f32 = jnp.float32
        bf16 = jnp.bfloat16

        # ------------------------------------------------------------------
        # Stage A: soft-prompt insertion (pure VPU selects, no MXU / one-hot).
        #   out[t] = raw[t]          for t <  sep
        #   out[t] = prompt[t - sep] for sep <= t < sep + P
        #   out[t] = raw[t - P]      for t >= sep + P
        # ------------------------------------------------------------------
        if use_prompt:
            prompt = prompt_ref[...].astype(f32)                       # (P, H)
            prompt_rows = [prompt[p:p + 1, :] for p in range(P)]       # hoisted
            zeros_p = jnp.zeros((P, H), f32)                           # hoisted
            row = jax.lax.broadcasted_iota(jnp.int32, (T, 1), 0)       # hoisted
            xs = []
            for b in range(B):
                sep = sep_ref[b]
                raw_b = raw_ref[b].astype(f32)                         # (S, H)
                raw_top = jnp.concatenate([raw_b, zeros_p], axis=0)    # t -> raw[t]
                raw_bot = jnp.concatenate([zeros_p, raw_b], axis=0)    # t -> raw[t-P]
                pro = jnp.zeros((T, H), f32)
                for p in range(P):        # P static selects (VPU), per example
                    pro = jnp.where(row == sep + p, prompt_rows[p], pro)
                xs.append(jnp.where(row < sep, raw_top,
                                    jnp.where(row < sep + P, pro, raw_bot)))
            x_all = jnp.concatenate(xs, axis=0)                        # (B*T, H)
        else:
            x_all = raw_ref[...].reshape(BT, H).astype(f32)

        # ------------------------------------------------------------------
        # Stage B: encoder layer, batch folded into the matmul row dimension.
        # bf16 MXU operands, f32 accumulation; LN/softmax in f32.
        # ------------------------------------------------------------------
        def mm(a, b):
            return jax.lax.dot_general(
                a.astype(bf16), b.astype(bf16), (((1,), (0,)), ((), ())),
                preferred_element_type=f32)

        q = mm(x_all, wq_ref[...])          # (B*T, H)
        k = mm(x_all, wk_ref[...])
        v = mm(x_all, wv_ref[...])

        scale = 1.0 / jnp.sqrt(f32(H))

        attn_rows = []
        for b in range(B):
            q_b = q[b * T:(b + 1) * T].astype(bf16)      # (T, H)
            k_b = k[b * T:(b + 1) * T].astype(bf16)      # (T, H)
            v_b = v[b * T:(b + 1) * T].astype(bf16)      # (T, H)
            # q @ k^T via contraction ((1,),(1,)).  At realistic T, pre-
            # transpose k once per example to keep the XLU free every step.
            s_b = jax.lax.dot_general(q_b, k_b, (((1,), (1,)), ((), ())),
                                      preferred_element_type=f32) * scale
            s_b = s_b + bias_ref[pl.ds(b, 1), :]          # (T,T) + (1,T)
            m_b = jnp.max(s_b, axis=-1, keepdims=True)
            e_b = jnp.exp(s_b - m_b)
            inv = pl.reciprocal(jnp.sum(e_b, axis=-1, keepdims=True), approx=True)
            p_b = (e_b * inv).astype(bf16)
            attn_rows.append(jax.lax.dot_general(
                p_b, v_b, (((1,), (0,)), ((), ())), preferred_element_type=f32))
        attn_all = jnp.concatenate(attn_rows, axis=0)     # (B*T, H)
        attn_out = mm(attn_all, wo_ref[...])

        def layernorm(h, g, be):
            mu = jnp.mean(h, axis=-1, keepdims=True)
            var = jnp.mean((h - mu) ** 2, axis=-1, keepdims=True)
            return (h - mu) * jax.lax.rsqrt(var + 1e-5) * g + be

        h1 = layernorm(x_all + attn_out, g1_ref[...], b1_ref[...])
        ffn = mm(jax.nn.gelu(mm(h1, w1_ref[...]), approximate=True), w2_ref[...])
        last = layernorm(h1 + ffn, g2_ref[...], b2_ref[...])     # (B*T, H) f32
        last_ref[...] = last

        # ------------------------------------------------------------------
        # Stage C: pooling + mask_hidden gather (dynamic pl.ds sublane slice).
        # ------------------------------------------------------------------
        for b in range(B):
            if pooling == "cls":
                pooled = last_ref[pl.ds(b * T, 1), :]                  # (1, H)
            else:  # "mean"
                pooled = jnp.mean(last[b * T:(b + 1) * T, :], axis=0,
                                  keepdims=True)
            hidden_ref[pl.ds(b, 1), :] = pooled.astype(hidden_ref.dtype)
            picked = last_ref[pl.ds(b * T + loc_ref[b], 1), :]         # (1, H)
            mask_ref[pl.ds(b, 1), :] = picked.astype(mask_ref.dtype)

    return kernel


# ---------------------------------------------------------------------------
# SoftPromptLM forward (thin JAX glue around the single fused kernel).
# ---------------------------------------------------------------------------
def soft_prompt_lm_forward(params, *, input_ids, attention_mask,
                           sep_locations=None, locations=None,
                           use_prompt=True, pooling="cls"):
    B, S = input_ids.shape
    H = params["word_embed"].shape[1]
    P = params["prompt_embed"].shape[0] - 1
    F = params["w1"].shape[1]

    if pooling not in ("cls", "mean"):
        # TODO(synk): 'pooled' mode needs the backbone pooler head (dense+tanh);
        # the synthetic backbone does not define one.
        raise ValueError("pooling mode must be cls or mean in this synthetic backbone")

    # backbone.embeddings(input_ids): word + position embedding lookup (glue).
    raw_embedding = (params["word_embed"][input_ids]
                     + params["pos_embed"][None, :S, :]).astype(jnp.float32)
    # pseudo_tokens = arange(1, P + 1) -> rows 1..P of the prompt table.
    prompt_embeds = params["prompt_embed"][1:P + 1].astype(jnp.float32)

    if use_prompt:
        T = S + P
        sep = sep_locations[:, 1].astype(jnp.int32)            # compact 1-D SMEM
        attn_full = jnp.concatenate(
            [jnp.ones((B, P), attention_mask.dtype), attention_mask], axis=1)
    else:
        T = S
        sep = jnp.zeros((B,), jnp.int32)
        attn_full = attention_mask
    attn_bias = (1.0 - attn_full.astype(jnp.float32)) * -1e9    # (B, T)

    loc = (locations if locations is not None
           else jnp.zeros((B,), jnp.int32)).astype(jnp.int32)

    # bf16 MXU weights (f32 accumulation inside the kernel); LN params stay f32.
    bf = jnp.bfloat16
    wq, wk, wv, wo = (params[n].astype(bf) for n in ("wq", "wk", "wv", "wo"))
    w1, w2 = params["w1"].astype(bf), params["w2"].astype(bf)

    kernel = make_fused_kernel(B, S, H, F, P, bool(use_prompt), pooling)

    smem = pl.BlockSpec(memory_space=pltpu.MemorySpace.SMEM)
    vmem = pl.BlockSpec(memory_space=pltpu.MemorySpace.VMEM)

    hidden, mask_hidden = pl.pallas_call(
        kernel,
        out_shape=(jax.ShapeDtypeStruct((B, H), jnp.float32),
                   jax.ShapeDtypeStruct((B, H), jnp.float32)),
        in_specs=[smem, smem] + [vmem] * 13,
        out_specs=(vmem, vmem),
        scratch_shapes=[pltpu.VMEM((B * T, H), jnp.float32)],
    )(sep, loc, raw_embedding, prompt_embeds, attn_bias,
      wq, wk, wv, wo, w1, w2,
      params["ln1_g"], params["ln1_b"], params["ln2_g"], params["ln2_b"])

    outputs = {"hidden": hidden}
    if locations is not None:
        outputs["mask_hidden"] = mask_hidden
    return outputs


# ---------------------------------------------------------------------------
# Deterministic parameter init + pure-JAX f32 reference for validation.
# ---------------------------------------------------------------------------
def init_params(key, vocab, S, H, F, P):
    ks = jax.random.split(key, 10)
    xavier = lambda k, shape: (jax.random.normal(k, shape, jnp.float32)
                               * (2.0 / (shape[0] + shape[1])) ** 0.5)
    return {
        "word_embed": jax.random.normal(ks[0], (vocab, H), jnp.float32) * 0.02,
        "pos_embed": jax.random.normal(ks[1], (S, H), jnp.float32) * 0.02,
        # torch.nn.init.xavier_normal_ on the (P+1, H) prompt embedding table.
        "prompt_embed": xavier(ks[2], (P + 1, H)),
        "wq": xavier(ks[3], (H, H)),
        "wk": xavier(ks[4], (H, H)),
        "wv": xavier(ks[5], (H, H)),
        "wo": xavier(ks[6], (H, H)),
        "w1": xavier(ks[7], (H, F)),
        "w2": xavier(ks[8], (F, H)),
        "ln1_g": jnp.ones((1, H), jnp.float32),
        "ln1_b": jnp.zeros((1, H), jnp.float32),
        "ln2_g": jnp.ones((1, H), jnp.float32),
        "ln2_b": jnp.zeros((1, H), jnp.float32),
    }


def reference_forward(params, input_ids, attention_mask, sep_locations, locations):
    B, S = input_ids.shape
    H = params["word_embed"].shape[1]
    P = params["prompt_embed"].shape[0] - 1
    raw = params["word_embed"][input_ids] + params["pos_embed"][None, :S, :]
    prompt = params["prompt_embed"][1:P + 1]
    embeds = []
    for i in range(B):
        sep = int(sep_locations[i, 1])
        embeds.append(jnp.concatenate([raw[i, :sep], prompt, raw[i, sep:]], axis=0))
    x = jnp.stack(embeds, axis=0)
    mask = jnp.concatenate([jnp.ones((B, P), jnp.float32), attention_mask], axis=1)
    bias = (1.0 - mask)[:, None, :] * -1e9

    q, k, v = x @ params["wq"], x @ params["wk"], x @ params["wv"]
    scores = jnp.einsum("btd,bsd->bts", q, k) / jnp.sqrt(jnp.float32(H)) + bias
    p = jax.nn.softmax(scores, axis=-1)
    attn = jnp.einsum("bts,bsd->btd", p, v) @ params["wo"]

    def layernorm(h, g, b_):
        mu = h.mean(-1, keepdims=True)
        var = ((h - mu) ** 2).mean(-1, keepdims=True)
        return (h - mu) * jax.lax.rsqrt(var + 1e-5) * g + b_

    h1 = layernorm(x + attn, params["ln1_g"], params["ln1_b"])
    ffn = jax.nn.gelu(h1 @ params["w1"], approximate=True) @ params["w2"]
    last = layernorm(h1 + ffn, params["ln2_g"], params["ln2_b"])
    out = {"hidden": last[:, 0, :]}
    out["mask_hidden"] = jnp.stack(
        [last[i, int(locations[i]), :] for i in range(B)], axis=0)
    return out


if __name__ == "__main__":
    B, S, H, F, P, VOCAB = 2, 16, 128, 256, 8, 32

    params = init_params(jax.random.PRNGKey(0), VOCAB, S, H, F, P)
    input_ids = jax.random.randint(jax.random.PRNGKey(1), (B, S), 0, VOCAB)
    attention_mask = jnp.ones((B, S), jnp.float32).at[1, S - 3:].set(0.0)
    sep_locations = jnp.array([[3, 7], [2, 10]], dtype=jnp.int32)   # uses column 1
    locations = jnp.array([1, 4], dtype=jnp.int32)

    outputs = soft_prompt_lm_forward(
        params,
        input_ids=input_ids,
        attention_mask=attention_mask,
        sep_locations=sep_locations,
        locations=locations,
        use_prompt=True,
        pooling="cls",
    )
    outputs = jax.block_until_ready(outputs)

    ref = reference_forward(params, input_ids, attention_mask, sep_locations, locations)
    for name in ("hidden", "mask_hidden"):
        assert outputs[name].shape == ref[name].shape, name
        assert jnp.allclose(outputs[name], ref[name], rtol=5e-2, atol=5e-2), name

    print("KERNEL_OK")
</pallas_src>

<mosaic_0001>
module attributes {stable_mosaic.version = 11 : i64} {
  func.func @kernel(%arg0: memref<2xi32, #tpu.memory_space<smem>>, %arg1: memref<2xi32, #tpu.memory_space<smem>>, %arg2: memref<2x16x128xf32, #tpu.memory_space<vmem>>, %arg3: memref<8x128xf32, #tpu.memory_space<vmem>>, %arg4: memref<2x24xf32, #tpu.memory_space<vmem>>, %arg5: memref<128x128xbf16, #tpu.memory_space<vmem>>, %arg6: memref<128x128xbf16, #tpu.memory_space<vmem>>, %arg7: memref<128x128xbf16, #tpu.memory_space<vmem>>, %arg8: memref<128x128xbf16, #tpu.memory_space<vmem>>, %arg9: memref<128x256xbf16, #tpu.memory_space<vmem>>, %arg10: memref<256x128xbf16, #tpu.memory_space<vmem>>, %arg11: memref<1x128xf32, #tpu.memory_space<vmem>>, %arg12: memref<1x128xf32, #tpu.memory_space<vmem>>, %arg13: memref<1x128xf32, #tpu.memory_space<vmem>>, %arg14: memref<1x128xf32, #tpu.memory_space<vmem>>, %arg15: memref<2x128xf32, #tpu.memory_space<vmem>>, %arg16: memref<2x128xf32, #tpu.memory_space<vmem>>, %arg17: memref<48x128xf32, #tpu.memory_space<vmem>>) attributes {dimension_semantics = [], scalar_prefetch = 0 : i64, scratch_operands = 1 : i64, tpu.core_type = #tpu.core_type<tc>} {
    %c0 = arith.constant 0 : index
    %c0_0 = arith.constant 0 : index
    %0 = vector.load %arg3[%c0, %c0_0] : memref<8x128xf32, #tpu.memory_space<vmem>>, vector<8x128xf32>
    %1 = vector.extract_strided_slice %0 {offsets = [0, 0], sizes = [1, 128], strides = [1, 1]} : vector<8x128xf32> to vector<1x128xf32>
    %2 = vector.extract_strided_slice %0 {offsets = [1, 0], sizes = [1, 128], strides = [1, 1]} : vector<8x128xf32> to vector<1x128xf32>
    %3 = vector.extract_strided_slice %0 {offsets = [2, 0], sizes = [1, 128], strides = [1, 1]} : vector<8x128xf32> to vector<1x128xf32>
    %4 = vector.extract_strided_slice %0 {offsets = [3, 0], sizes = [1, 128], strides = [1, 1]} : vector<8x128xf32> to vector<1x128xf32>
    %5 = vector.extract_strided_slice %0 {offsets = [4, 0], sizes = [1, 128], strides = [1, 1]} : vector<8x128xf32> to vector<1x128xf32>
    %6 = vector.extract_strided_slice %0 {offsets = [5, 0], sizes = [1, 128], strides = [1, 1]} : vector<8x128xf32> to vector<1x128xf32>
    %7 = vector.extract_strided_slice %0 {offsets = [6, 0], sizes = [1, 128], strides = [1, 1]} : vector<8x128xf32> to vector<1x128xf32>
    %8 = vector.extract_strided_slice %0 {offsets = [7, 0], sizes = [1, 128], strides = [1, 1]} : vector<8x128xf32> to vector<1x128xf32>
    %cst = arith.constant 0.000000e+00 : f32
    %9 = vector.broadcast %cst : f32 to vector<8x128xf32>
    %10 = tpu.iota {dimensions = array<i32: 0>} : vector<24x1xi32>
    %c0_1 = arith.constant 0 : index
    %11 = memref.load %arg0[%c0_1] : memref<2xi32, #tpu.memory_space<smem>>
    %c0_2 = arith.constant 0 : index
    %c0_3 = arith.constant 0 : index
    %c0_4 = arith.constant 0 : index
    %12 = vector.load %arg2[%c0_2, %c0_3, %c0_4] : memref<2x16x128xf32, #tpu.memory_space<vmem>>, vector<1x16x128xf32>
    %13 = vector.shape_cast %12 : vector<1x16x128xf32> to vector<16x128xf32>
    %14 = tpu.concatenate %13, %9 in 0 : vector<16x128xf32>, vector<8x128xf32> -> vector<24x128xf32>
    %15 = tpu.concatenate %9, %13 in 0 : vector<8x128xf32>, vector<16x128xf32> -> vector<24x128xf32>
    %cst_5 = arith.constant 0.000000e+00 : f32
    %16 = vector.broadcast %cst_5 : f32 to vector<24x128xf32>
    %c0_i32 = arith.constant 0 : i32
    %17 = arith.addi %11, %c0_i32 : i32
    %18 = vector.broadcast %17 : i32 to vector<24x1xi32>
    %19 = arith.cmpi eq, %10, %18 : vector<24x1xi32>
    %20 = vector.shape_cast %19 : vector<24x1xi1> to vector<24x1xi1>
    %21 = vector.broadcast %20 : vector<24x1xi1> to vector<24x128xi1>
    %22 = vector.shape_cast %1 : vector<1x128xf32> to vector<1x128xf32>
    %23 = vector.broadcast %22 : vector<1x128xf32> to vector<24x128xf32>
    %24 = arith.select %21, %23, %16 : vector<24x128xi1>, vector<24x128xf32>
    %c1_i32 = arith.constant 1 : i32
    %25 = arith.addi %11, %c1_i32 : i32
    %26 = vector.broadcast %25 : i32 to vector<24x1xi32>
    %27 = arith.cmpi eq, %10, %26 : vector<24x1xi32>
    %28 = vector.shape_cast %27 : vector<24x1xi1> to vector<24x1xi1>
    %29 = vector.broadcast %28 : vector<24x1xi1> to vector<24x128xi1>
    %30 = vector.shape_cast %2 : vector<1x128xf32> to vector<1x128xf32>
    %31 = vector.broadcast %30 : vector<1x128xf32> to vector<24x128xf32>
    %32 = arith.select %29, %31, %24 : vector<24x128xi1>, vector<24x128xf32>
    %c2_i32 = arith.constant 2 : i32
    %33 = arith.addi %11, %c2_i32 : i32
    %34 = vector.broadcast %33 : i32 to vector<24x1xi32>
    %35 = arith.cmpi eq, %10, %34 : vector<24x1xi32>
    %36 = vector.shape_cast %35 : vector<24x1xi1> to vector<24x1xi1>
    %37 = vector.broadcast %36 : vector<24x1xi1> to vector<24x128xi1>
    %38 = vector.shape_cast %3 : vector<1x128xf32> to vector<1x128xf32>
    %39 = vector.broadcast %38 : vector<1x128xf32> to vector<24x128xf32>
    %40 = arith.select %37, %39, %32 : vector<24x128xi1>, vector<24x128xf32>
    %c3_i32 = arith.constant 3 : i32
    %41 = arith.addi %11, %c3_i32 : i32
    %42 = vector.broadcast %41 : i32 to vector<24x1xi32>
    %43 = arith.cmpi eq, %10, %42 : vector<24x1xi32>
    %44 = vector.shape_cast %43 : vector<24x1xi1> to vector<24x1xi1>
    %45 = vector.broadcast %44 : vector<24x1xi1> to vector<24x128xi1>
    %46 = vector.shape_cast %4 : vector<1x128xf32> to vector<1x128xf32>
    %47 = vector.broadcast %46 : vector<1x128xf32> to vector<24x128xf32>
    %48 = arith.select %45, %47, %40 : vector<24x128xi1>, vector<24x128xf32>
    %c4_i32 = arith.constant 4 : i32
    %49 = arith.addi %11, %c4_i32 : i32
    %50 = vector.broadcast %49 : i32 to vector<24x1xi32>
    %51 = arith.cmpi eq, %10, %50 : vector<24x1xi32>
    %52 = vector.shape_cast %51 : vector<24x1xi1> to vector<24x1xi1>
    %53 = vector.broadcast %52 : vector<24x1xi1> to vector<24x128xi1>
    %54 = vector.shape_cast %5 : vector<1x128xf32> to vector<1x128xf32>
    %55 = vector.broadcast %54 : vector<1x128xf32> to vector<24x128xf32>
    %56 = arith.select %53, %55, %48 : vector<24x128xi1>, vector<24x128xf32>
    %c5_i32 = arith.constant 5 : i32
    %57 = arith.addi %11, %c5_i32 : i32
    %58 = vector.broadcast %57 : i32 to vector<24x1xi32>
    %59 = arith.cmpi eq, %10, %58 : vector<24x1xi32>
    %60 = vector.shape_cast %59 : vector<24x1xi1> to vector<24x1xi1>
    %61 = vector.broadcast %60 : vector<24x1xi1> to vector<24x128xi1>
    %62 = vector.shape_cast %6 : vector<1x128xf32> to vector<1x128xf32>
    %63 = vector.broadcast %62 : vector<1x128xf32> to vector<24x128xf32>
    %64 = arith.select %61, %63, %56 : vector<24x128xi1>, vector<24x128xf32>
    %c6_i32 = arith.constant 6 : i32
    %65 = arith.addi %11, %c6_i32 : i32
    %66 = vector.broadcast %65 : i32 to vector<24x1xi32>
    %67 = arith.cmpi eq, %10, %66 : vector<24x1xi32>
    %68 = vector.shape_cast %67 : vector<24x1xi1> to vector<24x1xi1>
    %69 = vector.broadcast %68 : vector<24x1xi1> to vector<24x128xi1>
    %70 = vector.shape_cast %7 : vector<1x128xf32> to vector<1x128xf32>
    %71 = vector.broadcast %70 : vector<1x128xf32> to vector<24x128xf32>
    %72 = arith.select %69, %71, %64 : vector<24x128xi1>, vector<24x128xf32>
    %c7_i32 = arith.constant 7 : i32
    %73 = arith.addi %11, %c7_i32 : i32
    %74 = vector.broadcast %73 : i32 to vector<24x1xi32>
    %75 = arith.cmpi eq, %10, %74 : vector<24x1xi32>
    %76 = vector.shape_cast %75 : vector<24x1xi1> to vector<24x1xi1>
    %77 = vector.broadcast %76 : vector<24x1xi1> to vector<24x128xi1>
    %78 = vector.shape_cast %8 : vector<1x128xf32> to vector<1x128xf32>
    %79 = vector.broadcast %78 : vector<1x128xf32> to vector<24x128xf32>
    %80 = arith.select %77, %79, %72 : vector<24x128xi1>, vector<24x128xf32>
    %81 = vector.broadcast %11 : i32 to vector<24x1xi32>
    %82 = arith.cmpi slt, %10, %81 : vector<24x1xi32>
    %c8_i32 = arith.constant 8 : i32
    %83 = arith.addi %11, %c8_i32 : i32
    %84 = vector.broadcast %83 : i32 to vector<24x1xi32>
    %85 = arith.cmpi slt, %10, %84 : vector<24x1xi32>
    %86 = vector.shape_cast %85 : vector<24x1xi1> to vector<24x1xi1>
    %87 = vector.broadcast %86 : vector<24x1xi1> to vector<24x128xi1>
    %88 = arith.select %87, %80, %15 : vector<24x128xi1>, vector<24x128xf32>
    %89 = vector.shape_cast %82 : vector<24x1xi1> to vector<24x1xi1>
    %90 = vector.broadcast %89 : vector<24x1xi1> to vector<24x128xi1>
    %91 = arith.select %90, %14, %88 : vector<24x128xi1>, vector<24x128xf32>
    %c1 = arith.constant 1 : index
    %92 = memref.load %arg0[%c1] : memref<2xi32, #tpu.memory_space<smem>>
    %c1_6 = arith.constant 1 : index
    %c0_7 = arith.constant 0 : index
    %c0_8 = arith.constant 0 : index
    %93 = vector.load %arg2[%c1_6, %c0_7, %c0_8] : memref<2x16x128xf32, #tpu.memory_space<vmem>>, vector<1x16x128xf32>
    %94 = vector.shape_cast %93 : vector<1x16x128xf32> to vector<16x128xf32>
    %95 = tpu.concatenate %94, %9 in 0 : vector<16x128xf32>, vector<8x128xf32> -> vector<24x128xf32>
    %96 = tpu.concatenate %9, %94 in 0 : vector<8x128xf32>, vector<16x128xf32> -> vector<24x128xf32>
    %cst_9 = arith.constant 0.000000e+00 : f32
    %97 = vector.broadcast %cst_9 : f32 to vector<24x128xf32>
    %c0_i32_10 = arith.constant 0 : i32
    %98 = arith.addi %92, %c0_i32_10 : i32
    %99 = vector.broadcast %98 : i32 to vector<24x1xi32>
    %100 = arith.cmpi eq, %10, %99 : vector<24x1xi32>
    %101 = vector.shape_cast %100 : vector<24x1xi1> to vector<24x1xi1>
    %102 = vector.broadcast %101 : vector<24x1xi1> to vector<24x128xi1>
    %103 = vector.shape_cast %1 : vector<1x128xf32> to vector<1x128xf32>
    %104 = vector.broadcast %103 : vector<1x128xf32> to vector<24x128xf32>
    %105 = arith.select %102, %104, %97 : vector<24x128xi1>, vector<24x128xf32>
    %c1_i32_11 = arith.constant 1 : i32
    %106 = arith.addi %92, %c1_i32_11 : i32
    %107 = vector.broadcast %106 : i32 to vector<24x1xi32>
    %108 = arith.cmpi eq, %10, %107 : vector<24x1xi32>
    %109 = vector.shape_cast %108 : vector<24x1xi1> to vector<24x1xi1>
    %110 = vector.broadcast %109 : vector<24x1xi1> to vector<24x128xi1>
    %111 = vector.shape_cast %2 : vector<1x128xf32> to vector<1x128xf32>
    %112 = vector.broadcast %111 : vector<1x128xf32> to vector<24x128xf32>
    %113 = arith.select %110, %112, %105 : vector<24x128xi1>, vector<24x128xf32>
    %c2_i32_12 = arith.constant 2 : i32
    %114 = arith.addi %92, %c2_i32_12 : i32
    %115 = vector.broadcast %114 : i32 to vector<24x1xi32>
    %116 = arith.cmpi eq, %10, %115 : vector<24x1xi32>
    %117 = vector.shape_cast %116 : vector<24x1xi1> to vector<24x1xi1>
    %118 = vector.broadcast %117 : vector<24x1xi1> to vector<24x128xi1>
    %119 = vector.shape_cast %3 : vector<1x128xf32> to vector<1x128xf32>
    %120 = vector.broadcast %119 : vector<1x128xf32> to vector<24x128xf32>
    %121 = arith.select %118, %120, %113 : vector<24x128xi1>, vector<24x128xf32>
    %c3_i32_13 = arith.constant 3 : i32
    %122 = arith.addi %92, %c3_i32_13 : i32
    %123 = vector.broadcast %122 : i32 to vector<24x1xi32>
    %124 = arith.cmpi eq, %10, %123 : vector<24x1xi32>
    %125 = vector.shape_cast %124 : vector<24x1xi1> to vector<24x1xi1>
    %126 = vector.broadcast %125 : vector<24x1xi1> to vector<24x128xi1>
    %127 = vector.shape_cast %4 : vector<1x128xf32> to vector<1x128xf32>
    %128 = vector.broadcast %127 : vector<1x128xf32> to vector<24x128xf32>
    %129 = arith.select %126, %128, %121 : vector<24x128xi1>, vector<24x128xf32>
    %c4_i32_14 = arith.constant 4 : i32
    %130 = arith.addi %92, %c4_i32_14 : i32
    %131 = vector.broadcast %130 : i32 to vector<24x1xi32>
    %132 = arith.cmpi eq, %10, %131 : vector<24x1xi32>
    %133 = vector.shape_cast %132 : vector<24x1xi1> to vector<24x1xi1>
    %134 = vector.broadcast %133 : vector<24x1xi1> to vector<24x128xi1>
    %135 = vector.shape_cast %5 : vector<1x128xf32> to vector<1x128xf32>
    %136 = vector.broadcast %135 : vector<1x128xf32> to vector<24x128xf32>
    %137 = arith.select %134, %136, %129 : vector<24x128xi1>, vector<24x128xf32>
    %c5_i32_15 = arith.constant 5 : i32
    %138 = arith.addi %92, %c5_i32_15 : i32
    %139 = vector.broadcast %138 : i32 to vector<24x1xi32>
    %140 = arith.cmpi eq, %10, %139 : vector<24x1xi32>
    %141 = vector.shape_cast %140 : vector<24x1xi1> to vector<24x1xi1>
    %142 = vector.broadcast %141 : vector<24x1xi1> to vector<24x128xi1>
    %143 = vector.shape_cast %6 : vector<1x128xf32> to vector<1x128xf32>
    %144 = vector.broadcast %143 : vector<1x128xf32> to vector<24x128xf32>
    %145 = arith.select %142, %144, %137 : vector<24x128xi1>, vector<24x128xf32>
    %c6_i32_16 = arith.constant 6 : i32
    %146 = arith.addi %92, %c6_i32_16 : i32
    %147 = vector.broadcast %146 : i32 to vector<24x1xi32>
    %148 = arith.cmpi eq, %10, %147 : vector<24x1xi32>
    %149 = vector.shape_cast %148 : vector<24x1xi1> to vector<24x1xi1>
    %150 = vector.broadcast %149 : vector<24x1xi1> to vector<24x128xi1>
    %151 = vector.shape_cast %7 : vector<1x128xf32> to vector<1x128xf32>
    %152 = vector.broadcast %151 : vector<1x128xf32> to vector<24x128xf32>
    %153 = arith.select %150, %152, %145 : vector<24x128xi1>, vector<24x128xf32>
    %c7_i32_17 = arith.constant 7 : i32
    %154 = arith.addi %92, %c7_i32_17 : i32
    %155 = vector.broadcast %154 : i32 to vector<24x1xi32>
    %156 = arith.cmpi eq, %10, %155 : vector<24x1xi32>
    %157 = vector.shape_cast %156 : vector<24x1xi1> to vector<24x1xi1>
    %158 = vector.broadcast %157 : vector<24x1xi1> to vector<24x128xi1>
    %159 = vector.shape_cast %8 : vector<1x128xf32> to vector<1x128xf32>
    %160 = vector.broadcast %159 : vector<1x128xf32> to vector<24x128xf32>
    %161 = arith.select %158, %160, %153 : vector<24x128xi1>, vector<24x128xf32>
    %162 = vector.broadcast %92 : i32 to vector<24x1xi32>
    %163 = arith.cmpi slt, %10, %162 : vector<24x1xi32>
    %c8_i32_18 = arith.constant 8 : i32
    %164 = arith.addi %92, %c8_i32_18 : i32
    %165 = vector.broadcast %164 : i32 to vector<24x1xi32>
    %166 = arith.cmpi slt, %10, %165 : vector<24x1xi32>
    %167 = vector.shape_cast %166 : vector<24x1xi1> to vector<24x1xi1>
    %168 = vector.broadcast %167 : vector<24x1xi1> to vector<24x128xi1>
    %169 = arith.select %168, %161, %96 : vector<24x128xi1>, vector<24x128xf32>
    %170 = vector.shape_cast %163 : vector<24x1xi1> to vector<24x1xi1>
    %171 = vector.broadcast %170 : vector<24x1xi1> to vector<24x128xi1>
    %172 = arith.select %171, %95, %169 : vector<24x128xi1>, vector<24x128xf32>
    %173 = tpu.concatenate %91, %172 in 0 : vector<24x128xf32>, vector<24x128xf32> -> vector<48x128xf32>
    %c0_19 = arith.constant 0 : index
    %c0_20 = arith.constant 0 : index
    %174 = vector.load %arg5[%c0_19, %c0_20] : memref<128x128xbf16, #tpu.memory_space<vmem>>, vector<128x128xbf16>
    %175 = arith.truncf %173 : vector<48x128xf32> to vector<48x128xbf16>
    %cst_21 = arith.constant dense<0.000000e+00> : vector<48x128xf32>
    %176 = tpu.matmul %175, %174, %cst_21 {dimension_numbers = #tpu.dot_dimension_numbers<[1], [0], [0], [1], [0, 0, 1, 1], [], []>} : vector<48x128xbf16>, vector<128x128xbf16>, vector<48x128xf32> -> vector<48x128xf32>
    %c0_22 = arith.constant 0 : index
    %c0_23 = arith.constant 0 : index
    %177 = vector.load %arg6[%c0_22, %c0_23] : memref<128x128xbf16, #tpu.memory_space<vmem>>, vector<128x128xbf16>
    %178 = arith.truncf %173 : vector<48x128xf32> to vector<48x128xbf16>
    %cst_24 = arith.constant dense<0.000000e+00> : vector<48x128xf32>
    %179 = tpu.matmul %178, %177, %cst_24 {dimension_numbers = #tpu.dot_dimension_numbers<[1], [0], [0], [1], [0, 0, 1, 1], [], []>} : vector<48x128xbf16>, vector<128x128xbf16>, vector<48x128xf32> -> vector<48x128xf32>
    %c0_25 = arith.constant 0 : index
    %c0_26 = arith.constant 0 : index
    %180 = vector.load %arg7[%c0_25, %c0_26] : memref<128x128xbf16, #tpu.memory_space<vmem>>, vector<128x128xbf16>
    %181 = arith.truncf %173 : vector<48x128xf32> to vector<48x128xbf16>
    %cst_27 = arith.constant dense<0.000000e+00> : vector<48x128xf32>
    %182 = tpu.matmul %181, %180, %cst_27 {dimension_numbers = #tpu.dot_dimension_numbers<[1], [0], [0], [1], [0, 0, 1, 1], [], []>} : vector<48x128xbf16>, vector<128x128xbf16>, vector<48x128xf32> -> vector<48x128xf32>
    %cst_28 = arith.constant 1.280000e+02 : f32
    %183 = math.sqrt %cst_28 : f32
    %cst_29 = arith.constant 1.000000e+00 : f32
    %184 = arith.divf %cst_29, %183 : f32
    %185 = vector.extract_strided_slice %176 {offsets = [0, 0], sizes = [24, 128], strides = [1, 1]} : vector<48x128xf32> to vector<24x128xf32>
    %186 = arith.truncf %185 : vector<24x128xf32> to vector<24x128xbf16>
    %187 = vector.extract_strided_slice %179 {offsets = [0, 0], sizes = [24, 128], strides = [1, 1]} : vector<48x128xf32> to vector<24x128xf32>
    %188 = arith.truncf %187 : vector<24x128xf32> to vector<24x128xbf16>
    %189 = vector.extract_strided_slice %182 {offsets = [0, 0], sizes = [24, 128], strides = [1, 1]} : vector<48x128xf32> to vector<24x128xf32>
    %190 = arith.truncf %189 : vector<24x128xf32> to vector<24x128xbf16>
    %cst_30 = arith.constant dense<0.000000e+00> : vector<24x24xf32>
    %191 = tpu.matmul %186, %188, %cst_30 {dimension_numbers = #tpu.dot_dimension_numbers<[1], [1], [0], [0], [0, 0, 1, 0], [], []>} : vector<24x128xbf16>, vector<24x128xbf16>, vector<24x24xf32> -> vector<24x24xf32>
    %192 = vector.broadcast %184 : f32 to vector<24x24xf32>
    %193 = arith.mulf %191, %192 : vector<24x24xf32>
    %c0_31 = arith.constant 0 : index
    %c0_32 = arith.constant 0 : index
    %194 = vector.load %arg4[%c0_31, %c0_32] : memref<2x24xf32, #tpu.memory_space<vmem>>, vector<1x24xf32>
    %195 = vector.broadcast %194 : vector<1x24xf32> to vector<24x24xf32>
    %196 = arith.addf %193, %195 : vector<24x24xf32>
    %cst_33 = arith.constant dense<0xFF800000> : vector<24xf32>
    %197 = vector.multi_reduction <maximumf>, %196, %cst_33 [1] : vector<24x24xf32> to vector<24xf32>
    %198 = vector.shape_cast %197 : vector<24xf32> to vector<24x1xf32>
    %199 = vector.broadcast %198 : vector<24x1xf32> to vector<24x24xf32>
    %200 = arith.subf %196, %199 : vector<24x24xf32>
    %201 = math.exp %200 : vector<24x24xf32>
    %cst_34 = arith.constant dense<0.000000e+00> : vector<24xf32>
    %202 = vector.multi_reduction <add>, %201, %cst_34 [1] : vector<24x24xf32> to vector<24xf32>
    %203 = vector.shape_cast %202 : vector<24xf32> to vector<24x1xf32>
    %204 = tpu.reciprocal %203 {approx = true} : vector<24x1xf32> -> vector<24x1xf32>
    %205 = vector.broadcast %204 : vector<24x1xf32> to vector<24x24xf32>
    %206 = arith.mulf %201, %205 : vector<24x24xf32>
    %207 = arith.truncf %206 : vector<24x24xf32> to vector<24x24xbf16>
    %cst_35 = arith.constant dense<0.000000e+00> : vector<24x128xf32>
    %208 = tpu.matmul %207, %190, %cst_35 {dimension_numbers = #tpu.dot_dimension_numbers<[1], [0], [0], [1], [0, 0, 1, 1], [], []>} : vector<24x24xbf16>, vector<24x128xbf16>, vector<24x128xf32> -> vector<24x128xf32>
    %209 = vector.extract_strided_slice %176 {offsets = [24, 0], sizes = [24, 128], strides = [1, 1]} : vector<48x128xf32> to vector<24x128xf32>
    %210 = arith.truncf %209 : vector<24x128xf32> to vector<24x128xbf16>
    %211 = vector.extract_strided_slice %179 {offsets = [24, 0], sizes = [24, 128], strides = [1, 1]} : vector<48x128xf32> to vector<24x128xf32>
    %212 = arith.truncf %211 : vector<24x128xf32> to vector<24x128xbf16>
    %213 = vector.extract_strided_slice %182 {offsets = [24, 0], sizes = [24, 128], strides = [1, 1]} : vector<48x128xf32> to vector<24x128xf32>
    %214 = arith.truncf %213 : vector<24x128xf32> to vector<24x128xbf16>
    %cst_36 = arith.constant dense<0.000000e+00> : vector<24x24xf32>
    %215 = tpu.matmul %210, %212, %cst_36 {dimension_numbers = #tpu.dot_dimension_numbers<[1], [1], [0], [0], [0, 0, 1, 0], [], []>} : vector<24x128xbf16>, vector<24x128xbf16>, vector<24x24xf32> -> vector<24x24xf32>
    %216 = vector.broadcast %184 : f32 to vector<24x24xf32>
    %217 = arith.mulf %215, %216 : vector<24x24xf32>
    %c1_37 = arith.constant 1 : index
    %c0_38 = arith.constant 0 : index
    %218 = vector.load %arg4[%c1_37, %c0_38] : memref<2x24xf32, #tpu.memory_space<vmem>>, vector<1x24xf32>
    %219 = vector.broadcast %218 : vector<1x24xf32> to vector<24x24xf32>
    %220 = arith.addf %217, %219 : vector<24x24xf32>
    %cst_39 = arith.constant dense<0xFF800000> : vector<24xf32>
    %221 = vector.multi_reduction <maximumf>, %220, %cst_39 [1] : vector<24x24xf32> to vector<24xf32>
    %222 = vector.shape_cast %221 : vector<24xf32> to vector<24x1xf32>
    %223 = vector.broadcast %222 : vector<24x1xf32> to vector<24x24xf32>
    %224 = arith.subf %220, %223 : vector<24x24xf32>
    %225 = math.exp %224 : vector<24x24xf32>
    %cst_40 = arith.constant dense<0.000000e+00> : vector<24xf32>
    %226 = vector.multi_reduction <add>, %225, %cst_40 [1] : vector<24x24xf32> to vector<24xf32>
    %227 = vector.shape_cast %226 : vector<24xf32> to vector<24x1xf32>
    %228 = tpu.reciprocal %227 {approx = true} : vector<24x1xf32> -> vector<24x1xf32>
    %229 = vector.broadcast %228 : vector<24x1xf32> to vector<24x24xf32>
    %230 = arith.mulf %225, %229 : vector<24x24xf32>
    %231 = arith.truncf %230 : vector<24x24xf32> to vector<24x24xbf16>
    %cst_41 = arith.constant dense<0.000000e+00> : vector<24x128xf32>
    %232 = tpu.matmul %231, %214, %cst_41 {dimension_numbers = #tpu.dot_dimension_numbers<[1], [0], [0], [1], [0, 0, 1, 1], [], []>} : vector<24x24xbf16>, vector<24x128xbf16>, vector<24x128xf32> -> vector<24x128xf32>
    %233 = tpu.concatenate %208, %232 in 0 : vector<24x128xf32>, vector<24x128xf32> -> vector<48x128xf32>
    %c0_42 = arith.constant 0 : index
    %c0_43 = arith.constant 0 : index
    %234 = vector.load %arg8[%c0_42, %c0_43] : memref<128x128xbf16, #tpu.memory_space<vmem>>, vector<128x128xbf16>
    %235 = arith.truncf %233 : vector<48x128xf32> to vector<48x128xbf16>
    %cst_44 = arith.constant dense<0.000000e+00> : vector<48x128xf32>
    %236 = tpu.matmul %235, %234, %cst_44 {dimension_numbers = #tpu.dot_dimension_numbers<[1], [0], [0], [1], [0, 0, 1, 1], [], []>} : vector<48x128xbf16>, vector<128x128xbf16>, vector<48x128xf32> -> vector<48x128xf32>
    %237 = arith.addf %173, %236 : vector<48x128xf32>
    %c0_45 = arith.constant 0 : index
    %c0_46 = arith.constant 0 : index
    %238 = vector.load %arg11[%c0_45, %c0_46] : memref<1x128xf32, #tpu.memory_space<vmem>>, vector<1x128xf32>
    %c0_47 = arith.constant 0 : index
    %c0_48 = arith.constant 0 : index
    %239 = vector.load %arg12[%c0_47, %c0_48] : memref<1x128xf32, #tpu.memory_space<vmem>>, vector<1x128xf32>
    %cst_49 = arith.constant dense<0.000000e+00> : vector<48xf32>
    %240 = vector.multi_reduction <add>, %237, %cst_49 [1] : vector<48x128xf32> to vector<48xf32>
    %241 = vector.shape_cast %240 : vector<48xf32> to vector<48x1xf32>
    %cst_50 = arith.constant 1.280000e+02 : f32
    %242 = vector.broadcast %cst_50 : f32 to vector<48x1xf32>
    %243 = arith.divf %241, %242 : vector<48x1xf32>
    %244 = vector.broadcast %243 : vector<48x1xf32> to vector<48x128xf32>
    %245 = arith.subf %237, %244 : vector<48x128xf32>
    %246 = arith.mulf %245, %245 : vector<48x128xf32>
    %cst_51 = arith.constant dense<0.000000e+00> : vector<48xf32>
    %247 = vector.multi_reduction <add>, %246, %cst_51 [1] : vector<48x128xf32> to vector<48xf32>
    %248 = vector.shape_cast %247 : vector<48xf32> to vector<48x1xf32>
    %cst_52 = arith.constant 1.280000e+02 : f32
    %249 = vector.broadcast %cst_52 : f32 to vector<48x1xf32>
    %250 = arith.divf %248, %249 : vector<48x1xf32>
    %251 = vector.broadcast %243 : vector<48x1xf32> to vector<48x128xf32>
    %252 = arith.subf %237, %251 : vector<48x128xf32>
    %cst_53 = arith.constant 9.99999974E-6 : f32
    %253 = vector.broadcast %cst_53 : f32 to vector<48x1xf32>
    %254 = arith.addf %250, %253 : vector<48x1xf32>
    %255 = math.rsqrt %254 : vector<48x1xf32>
    %256 = vector.broadcast %255 : vector<48x1xf32> to vector<48x128xf32>
    %257 = arith.mulf %252, %256 : vector<48x128xf32>
    %258 = vector.broadcast %238 : vector<1x128xf32> to vector<48x128xf32>
    %259 = arith.mulf %257, %258 : vector<48x128xf32>
    %260 = vector.broadcast %239 : vector<1x128xf32> to vector<48x128xf32>
    %261 = arith.addf %259, %260 : vector<48x128xf32>
    %c0_54 = arith.constant 0 : index
    %c0_55 = arith.constant 0 : index
    %262 = vector.load %arg9[%c0_54, %c0_55] : memref<128x256xbf16, #tpu.memory_space<vmem>>, vector<128x256xbf16>
    %263 = arith.truncf %261 : vector<48x128xf32> to vector<48x128xbf16>
    %cst_56 = arith.constant dense<0.000000e+00> : vector<48x256xf32>
    %264 = tpu.matmul %263, %262, %cst_56 {dimension_numbers = #tpu.dot_dimension_numbers<[1], [0], [0], [1], [0, 0, 1, 1], [], []>} : vector<48x128xbf16>, vector<128x256xbf16>, vector<48x256xf32> -> vector<48x256xf32>
    %265 = arith.mulf %264, %264 : vector<48x256xf32>
    %266 = arith.mulf %264, %265 : vector<48x256xf32>
    %cst_57 = arith.constant 4.471500e-02 : f32
    %267 = vector.broadcast %cst_57 : f32 to vector<48x256xf32>
    %268 = arith.mulf %267, %266 : vector<48x256xf32>
    %269 = arith.addf %264, %268 : vector<48x256xf32>
    %cst_58 = arith.constant 0.797884583 : f32
    %270 = vector.broadcast %cst_58 : f32 to vector<48x256xf32>
    %271 = arith.mulf %270, %269 : vector<48x256xf32>
    %272 = math.tanh %271 : vector<48x256xf32>
    %cst_59 = arith.constant 1.000000e+00 : f32
    %273 = vector.broadcast %cst_59 : f32 to vector<48x256xf32>
    %274 = arith.addf %273, %272 : vector<48x256xf32>
    %cst_60 = arith.constant 5.000000e-01 : f32
    %275 = vector.broadcast %cst_60 : f32 to vector<48x256xf32>
    %276 = arith.mulf %275, %274 : vector<48x256xf32>
    %277 = arith.mulf %264, %276 : vector<48x256xf32>
    %c0_61 = arith.constant 0 : index
    %c0_62 = arith.constant 0 : index
    %278 = vector.load %arg10[%c0_61, %c0_62] : memref<256x128xbf16, #tpu.memory_space<vmem>>, vector<256x128xbf16>
    %279 = arith.truncf %277 : vector<48x256xf32> to vector<48x256xbf16>
    %cst_63 = arith.constant dense<0.000000e+00> : vector<48x128xf32>
    %280 = tpu.matmul %279, %278, %cst_63 {dimension_numbers = #tpu.dot_dimension_numbers<[1], [0], [0], [1], [0, 0, 1, 1], [], []>} : vector<48x256xbf16>, vector<256x128xbf16>, vector<48x128xf32> -> vector<48x128xf32>
    %281 = arith.addf %261, %280 : vector<48x128xf32>
    %c0_64 = arith.constant 0 : index
    %c0_65 = arith.constant 0 : index
    %282 = vector.load %arg13[%c0_64, %c0_65] : memref<1x128xf32, #tpu.memory_space<vmem>>, vector<1x128xf32>
    %c0_66 = arith.constant 0 : index
    %c0_67 = arith.constant 0 : index
    %283 = vector.load %arg14[%c0_66, %c0_67] : memref<1x128xf32, #tpu.memory_space<vmem>>, vector<1x128xf32>
    %cst_68 = arith.constant dense<0.000000e+00> : vector<48xf32>
    %284 = vector.multi_reduction <add>, %281, %cst_68 [1] : vector<48x128xf32> to vector<48xf32>
    %285 = vector.shape_cast %284 : vector<48xf32> to vector<48x1xf32>
    %cst_69 = arith.constant 1.280000e+02 : f32
    %286 = vector.broadcast %cst_69 : f32 to vector<48x1xf32>
    %287 = arith.divf %285, %286 : vector<48x1xf32>
    %288 = vector.broadcast %287 : vector<48x1xf32> to vector<48x128xf32>
    %289 = arith.subf %281, %288 : vector<48x128xf32>
    %290 = arith.mulf %289, %289 : vector<48x128xf32>
    %cst_70 = arith.constant dense<0.000000e+00> : vector<48xf32>
    %291 = vector.multi_reduction <add>, %290, %cst_70 [1] : vector<48x128xf32> to vector<48xf32>
    %292 = vector.shape_cast %291 : vector<48xf32> to vector<48x1xf32>
    %cst_71 = arith.constant 1.280000e+02 : f32
    %293 = vector.broadcast %cst_71 : f32 to vector<48x1xf32>
    %294 = arith.divf %292, %293 : vector<48x1xf32>
    %295 = vector.broadcast %287 : vector<48x1xf32> to vector<48x128xf32>
    %296 = arith.subf %281, %295 : vector<48x128xf32>
    %cst_72 = arith.constant 9.99999974E-6 : f32
    %297 = vector.broadcast %cst_72 : f32 to vector<48x1xf32>
    %298 = arith.addf %294, %297 : vector<48x1xf32>
    %299 = math.rsqrt %298 : vector<48x1xf32>
    %300 = vector.broadcast %299 : vector<48x1xf32> to vector<48x128xf32>
    %301 = arith.mulf %296, %300 : vector<48x128xf32>
    %302 = vector.broadcast %282 : vector<1x128xf32> to vector<48x128xf32>
    %303 = arith.mulf %301, %302 : vector<48x128xf32>
    %304 = vector.broadcast %283 : vector<1x128xf32> to vector<48x128xf32>
    %305 = arith.addf %303, %304 : vector<48x128xf32>
    %c0_73 = arith.constant 0 : index
    %c0_74 = arith.constant 0 : index
    %306 = vector.load %arg17[%c0_73, %c0_74] : memref<48x128xf32, #tpu.memory_space<vmem>>, vector<48x128xf32>
    tpu.vector_store %arg17[%c0_73, %c0_74], %305 {strides = array<i32>} : memref<48x128xf32, #tpu.memory_space<vmem>>, vector<48x128xf32>,
    %c0_75 = arith.constant 0 : index
    %c0_76 = arith.constant 0 : index
    %307 = vector.load %arg17[%c0_75, %c0_76] : memref<48x128xf32, #tpu.memory_space<vmem>>, vector<1x128xf32>
    %c0_77 = arith.constant 0 : index
    %c0_78 = arith.constant 0 : index
    %308 = vector.load %arg15[%c0_77, %c0_78] : memref<2x128xf32, #tpu.memory_space<vmem>>, vector<1x128xf32>
    tpu.vector_store %arg15[%c0_77, %c0_78], %307 {strides = array<i32>} : memref<2x128xf32, #tpu.memory_space<vmem>>, vector<1x128xf32>,
    %c0_79 = arith.constant 0 : index
    %309 = memref.load %arg1[%c0_79] : memref<2xi32, #tpu.memory_space<smem>>
    %c0_i32_80 = arith.constant 0 : i32
    %310 = arith.addi %c0_i32_80, %309 : i32
    %311 = arith.index_cast %310 : i32 to index
    %c0_81 = arith.constant 0 : index
    %312 = vector.load %arg17[%311, %c0_81] : memref<48x128xf32, #tpu.memory_space<vmem>>, vector<1x128xf32>
    %c0_82 = arith.constant 0 : index
    %c0_83 = arith.constant 0 : index
    %313 = vector.load %arg16[%c0_82, %c0_83] : memref<2x128xf32, #tpu.memory_space<vmem>>, vector<1x128xf32>
    tpu.vector_store %arg16[%c0_82, %c0_83], %312 {strides = array<i32>} : memref<2x128xf32, #tpu.memory_space<vmem>>, vector<1x128xf32>,
    %c24 = arith.constant 24 : index
    %c0_84 = arith.constant 0 : index
    %314 = vector.load %arg17[%c24, %c0_84] : memref<48x128xf32, #tpu.memory_space<vmem>>, vector<1x128xf32>
    %c1_85 = arith.constant 1 : index
    %c0_86 = arith.constant 0 : index
    %315 = vector.load %arg15[%c1_85, %c0_86] : memref<2x128xf32, #tpu.memory_space<vmem>>, vector<1x128xf32>
    tpu.vector_store %arg15[%c1_85, %c0_86], %314 {strides = array<i32>} : memref<2x128xf32, #tpu.memory_space<vmem>>, vector<1x128xf32>,
    %c1_87 = arith.constant 1 : index
    %316 = memref.load %arg1[%c1_87] : memref<2xi32, #tpu.memory_space<smem>>
    %c24_i32 = arith.constant 24 : i32
    %317 = arith.addi %c24_i32, %316 : i32
    %318 = arith.index_cast %317 : i32 to index
    %c0_88 = arith.constant 0 : index
    %319 = vector.load %arg17[%318, %c0_88] : memref<48x128xf32, #tpu.memory_space<vmem>>, vector<1x128xf32>
    %c1_89 = arith.constant 1 : index
    %c0_90 = arith.constant 0 : index
    %320 = vector.load %arg16[%c1_89, %c0_90] : memref<2x128xf32, #tpu.memory_space<vmem>>, vector<1x128xf32>
    tpu.vector_store %arg16[%c1_89, %c0_90], %319 {strides = array<i32>} : memref<2x128xf32, #tpu.memory_space<vmem>>, vector<1x128xf32>,
    return
  }
}

</mosaic_0001>

<bundles_post_ra>
// kernel: tpu_custom_call.1
= control target key start
LH: loop header
LB: loop body
LE: loop exit
PB: predicated region body
PF: predicated region fallthrough
CT: control target
= control target key end

     0   :  { %s3529_s0 = inlined_call_operand.hbm [shape: s32[2], index: 0, kind: input, shape index: {}]   ;;  %s3530_s1 = inlined_call_operand.vmem [shape: s32[2], index: 1, kind: input, shape index: {}]   ;;  %s3531_s2 = inlined_call_operand.hbm [shape: f32[2,16,128], index: 2, kind: input, shape index: {}]   ;;  %s3532_s3 = inlined_call_operand.vmem [shape: f32[8,128], index: 3, kind: input, shape index: {}]   ;;  %s3533_s4 = inlined_call_operand.vmem [shape: f32[2,24], index: 4, kind: input, shape index: {}]   ;;  %s3534_s5 = inlined_call_operand.hbm [shape: bf16[128,128], index: 5, kind: input, shape index: {}]   ;;  %s3535_s6 = inlined_call_operand.hbm [shape: bf16[128,128], index: 6, kind: input, shape index: {}]   ;;  %s3536_s7 = inlined_call_operand.hbm [shape: bf16[128,128], index: 7, kind: input, shape index: {}]   ;;  %s3537_s8 = inlined_call_operand.hbm [shape: bf16[128,128], index: 8, kind: input, shape index: {}]   ;;  %s3538_s9 = inlined_call_operand.hbm [shape: bf16[128,256], index: 9, kind: input, shape index: {}]   ;;  %s3539_s10 = inlined_call_operand.hbm [shape: bf16[256,128], index: 10, kind: input, shape index: {}]   ;;  %s3540_s11 = inlined_call_operand.vmem [shape: f32[1,128], index: 11, kind: input, shape index: {}]   ;;  %s3541_s12 = inlined_call_operand.vmem [shape: f32[1,128], index: 12, kind: input, shape index: {}]   ;;  %s3542_s13 = inlined_call_operand.vmem [shape: f32[1,128], index: 13, kind: input, shape index: {}]   ;;  %s3543_s14 = inlined_call_operand.vmem [shape: f32[1,128], index: 14, kind: input, shape index: {}]   ;;  %s3544_s15 = inlined_call_operand.hbm [shape: f32[2,128], index: 15, kind: output, shape index: {0}]   ;;  %s3545_s16 = inlined_call_operand.hbm [shape: f32[2,128], index: 16, kind: output, shape index: {1}]  }
   0x1   :  { %3549 = sst [smem:[#allocation30_spill]] %s3529_s0 }
   0x2   :  { %22 = vsyncpa [#allocation6], 0 }
   0x3   :  { %23 = vsyncpa [#allocation7], 0 }
   0x4   :  { %24 = vsyncpa [#allocation4], 0 }
   0x5   :  { %25 = vsyncpa [#allocation11], 0 }
   0x6   :  { %26 = vsyncpa [#allocation14], 0 }
   0x7   :  { %27 = vsyncpa [#allocation17], 0 }
   0x8   :  { %28 = vsyncpa [#allocation5], 0 }
   0x9   :  { %29 = vsyncpa [#allocation21], 0  ;;  %s2751_s21 = smov [#allocation10]   ;;  %s2515_s25 = scalar_lea.hbm %s3534_s5, 1024 }
   0xa   :  { %s69_s22 = sshll.u32 %s2751_s21, 4  ;;  %p2516_p0 = scmp.ne.s32.totalorder %s3534_s5, %s2515_s25  ;;  %s70_s22 = int_to_ptr.vmem [resolvable:$true] %s69_s22 }
   0xb   :  { %p2519_p1 = scmp.lt.u32.totalorder %s2515_s25, %s3534_s5 }
   0xd   :  { %p2521_p2 = pnand %p2519_p1, %p2516_p0 }
   0xf   :  { %2524 = shalt.err (!%p2521_p2)
}
  0x10   :  { %s2525_s30 = scalar_lea.vmem %s70_s22, 1024  ;;  %p2530_p4 = scmp.lt.s32.totalorder %s70_s22, %s70_s22 }
  0x11   :  { %p2526_p3 = scmp.ne.s32.totalorder %s70_s22, %s2525_s30  ;;  %p2531_p5 = scmp.lt.s32.totalorder %s2525_s30, %s2525_s30 }
  0x13   :  { %p2532_p6 = por %p2531_p5, %p2530_p4 }
  0x15   :  { %p2533_p7 = pnand %p2532_p6, %p2526_p3 }
  0x17   :  { %2536 = shalt.err (!%p2533_p7)
}
  0x18   :  { %s3547_s0 = smov 64   ;;  %s2753_s17 = smov 4  }
  0x19   :  { %75 = dma.hbm_to_vmem [thread:$0]  %s3534_s5, 1024, %s70_s22, [#allocation11], %s3547_s0, %s3547_s0, %s2753_s17  }
  0x1a   :  { %s2754_s20 = smov [#allocation13]   ;;  %s2537_s25 = scalar_lea.hbm %s3536_s7, 1024 }
  0x1b   :  { %s93_s21 = sshll.u32 %s2754_s20, 4  ;;  %p2538_p8 = scmp.ne.s32.totalorder %s3536_s7, %s2537_s25  ;;  %s94_s21 = int_to_ptr.vmem [resolvable:$true] %s93_s21 }
  0x1c   :  { %p2541_p9 = scmp.lt.u32.totalorder %s2537_s25, %s3536_s7 }
  0x1e   :  { %p2543_p10 = pnand %p2541_p9, %p2538_p8 }
  0x20   :  { %2546 = shalt.err (!%p2543_p10)
}
  0x21   :  { %s2547_s30 = scalar_lea.vmem %s94_s21, 1024  ;;  %p2552_p12 = scmp.lt.s32.totalorder %s94_s21, %s94_s21 }
  0x22   :  { %p2548_p11 = scmp.ne.s32.totalorder %s94_s21, %s2547_s30  ;;  %p2553_p13 = scmp.lt.s32.totalorder %s2547_s30, %s2547_s30 }
  0x24   :  { %p2554_p0 = por %p2553_p13, %p2552_p12 }
  0x26   :  { %p2555_p1 = pnand %p2554_p0, %p2548_p11 }
  0x28   :  { %2558 = shalt.err (!%p2555_p1)
}
  0x29   :  { %99 = dma.hbm_to_vmem [thread:$0]  %s3536_s7, 1024, %s94_s21, [#allocation14], %s3547_s0, %s3547_s0, %s2753_s17  }
  0x2a   :  { %s2755_s18 = smov [#allocation16]   ;;  %s44_s24 = sshll.u32 %s3530_s1, 4  ;;  %s2888_s24 = int_to_ptr.vmem [resolvable:$true] %s44_s24 }
  0x2b   :  { %s117_s19 = sshll.u32 %s2755_s18, 4  ;;  %s2559_s27 = scalar_lea.hbm %s3538_s9, 2048  ;;  %s118_s19 = int_to_ptr.vmem [resolvable:$true] %s117_s19 }
  0x2c   :  { %p2560_p2 = scmp.ne.s32.totalorder %s3538_s9, %s2559_s27  ;;  %p2563_p3 = scmp.lt.u32.totalorder %s2559_s27, %s3538_s9 }
  0x2e   :  { %p2565_p4 = pnand %p2563_p3, %p2560_p2 }
  0x30   :  { %2568 = shalt.err (!%p2565_p4)
}
  0x31   :  { %s2569_s7 = scalar_lea.vmem %s118_s19, 2048  ;;  %p2574_p6 = scmp.lt.s32.totalorder %s118_s19, %s118_s19 }
  0x32   :  { %p2570_p5 = scmp.ne.s32.totalorder %s118_s19, %s2569_s7  ;;  %p2575_p7 = scmp.lt.s32.totalorder %s2569_s7, %s2569_s7 }
  0x34   :  { %p2576_p8 = por %p2575_p7, %p2574_p6 }
  0x36   :  { %p2577_p9 = pnand %p2576_p8, %p2570_p5 }
  0x38   :  { %2580 = shalt.err (!%p2577_p9)
}
  0x39   :  { %s2756_s1 = smov 128   ;;  %s2757_s21 = smov 8  }
  0x3a   :  { %123 = dma.hbm_to_vmem [thread:$0]  %s3538_s9, 2048, %s118_s19, [#allocation17], %s2756_s1, %s2756_s1, %s2757_s21  }
  0x3b   :  { %s3550_s25 = sld [smem:[#allocation30_spill]] }
  0x41   :  { %s2581_s26 = scalar_lea.hbm %s3550_s25, 16 }
  0x42   :  { %p2582_p10 = scmp.ne.s32.totalorder %s3550_s25, %s2581_s26  ;;  %p2585_p11 = scmp.lt.u32.totalorder %s2581_s26, %s3550_s25 }
  0x44   :  { %p2587_p12 = pnand %p2585_p11, %p2582_p10 }
  0x46   :  { %2590 = shalt.err (!%p2587_p12)
}
  0x47   :  { %s2758_s5 = smov [#allocation3]   ;;  %s2591_s9 = scalar_lea.vmem %s2888_s24, 16 }
  0x48   :  { %37 = dma.hbm_to_smem %s3550_s25, 16, %s2758_s5, [#allocation6]  }
  0x49   :  { %p2592_p13 = scmp.ne.s32.totalorder %s2888_s24, %s2591_s9  ;;  %p2596_p0 = scmp.lt.s32.totalorder %s2888_s24, %s2888_s24 }
  0x4a   :  { %p2597_p1 = scmp.lt.s32.totalorder %s2591_s9, %s2591_s9 }
  0x4c   :  { %p2598_p2 = por %p2597_p1, %p2596_p0 }
  0x4e   :  { %p2599_p3 = pnand %p2598_p2, %p2592_p13 }
  0x50   :  { %2602 = shalt.err (!%p2599_p3)
}
  0x51   :  { %s2759_s19 = smov [#allocation8]   ;;  %s2760_s22 = smov [#allocation9]  }
  0x52   :  { %47 = dma.vmem_to_smem %s2888_s24, 16, %s2759_s19, [#allocation7]  }
  0x53   :  { %s53_s18 = sshll.u32 %s2760_s22, 4  ;;  %s2761_s20 = smov [#allocation12]   ;;  %s54_s18 = int_to_ptr.vmem [resolvable:$true] %s53_s18 }
  0x54   :  { %s81_s0 = sshll.u32 %s2761_s20, 4  ;;  %s2603_s25 = scalar_lea.hbm %s3531_s2, 512  ;;  %s82_s0 = int_to_ptr.vmem [resolvable:$true] %s81_s0 }
  0x55   :  { %p2604_p4 = scmp.ne.s32.totalorder %s3531_s2, %s2603_s25  ;;  %p2607_p5 = scmp.lt.u32.totalorder %s2603_s25, %s3531_s2 }
  0x57   :  { %p2609_p6 = pnand %p2607_p5, %p2604_p4 }
  0x59   :  { %2612 = shalt.err (!%p2609_p6)
}
  0x5a   :  { %s2613_s24 = scalar_lea.vmem %s54_s18, 512  ;;  %p2618_p8 = scmp.lt.s32.totalorder %s54_s18, %s54_s18 }
  0x5b   :  { %p2614_p7 = scmp.ne.s32.totalorder %s54_s18, %s2613_s24  ;;  %p2619_p9 = scmp.lt.s32.totalorder %s2613_s24, %s2613_s24 }
  0x5d   :  { %p2620_p10 = por %p2619_p9, %p2618_p8 }
  0x5f   :  { %p2621_p11 = pnand %p2620_p10, %p2614_p7 }
  0x61   :  { %2624 = shalt.err (!%p2621_p11)
}
  0x62   :  { %59 = dma.hbm_to_vmem [thread:$0]  %s3531_s2, 512, %s54_s18, [#allocation4], %s2756_s1, %s2756_s1, %s2757_s21  }
  0x63   :  { %s2625_s22 = scalar_lea.hbm %s3535_s6, 1024 }
  0x64   :  { %p2626_p12 = scmp.ne.s32.totalorder %s3535_s6, %s2625_s22  ;;  %p2629_p13 = scmp.lt.u32.totalorder %s2625_s22, %s3535_s6 }
  0x66   :  { %p2631_p0 = pnand %p2629_p13, %p2626_p12 }
  0x68   :  { %2634 = shalt.err (!%p2631_p0)
}
  0x69   :  { %s2635_s27 = scalar_lea.vmem %s82_s0, 1024  ;;  %p2640_p2 = scmp.lt.s32.totalorder %s82_s0, %s82_s0 }
  0x6a   :  { %p2636_p1 = scmp.ne.s32.totalorder %s82_s0, %s2635_s27  ;;  %p2641_p3 = scmp.lt.s32.totalorder %s2635_s27, %s2635_s27 }
  0x6c   :  { %p2642_p4 = por %p2641_p3, %p2640_p2 }
  0x6e   :  { %p2643_p5 = pnand %p2642_p4, %p2636_p1 }
  0x70   :  { %2646 = shalt.err (!%p2643_p5)
}
  0x71   :  { %s3551_s2 = smov 64   ;;  %s2762_s18 = smov [#allocation15]  }
  0x72   :  { %87 = dma.hbm_to_vmem [thread:$0]  %s3535_s6, 1024, %s82_s0, [#allocation11], %s3551_s2, %s3551_s2, %s2753_s17  }
  0x73   :  { %s105_s28 = sshll.u32 %s2762_s18, 4  ;;  %s2763_s29 = smov [#allocation18]   ;;  %s106_s28 = int_to_ptr.vmem [resolvable:$true] %s105_s28 }
  0x74   :  { %s129_s30 = sshll.u32 %s2763_s29, 4  ;;  %s2647_s7 = scalar_lea.hbm %s3537_s8, 1024  ;;  %s130_s30 = int_to_ptr.vmem [resolvable:$true] %s129_s30 }
  0x75   :  { %p2648_p6 = scmp.ne.s32.totalorder %s3537_s8, %s2647_s7  ;;  %p2651_p7 = scmp.lt.u32.totalorder %s2647_s7, %s3537_s8 }
  0x77   :  { %p2653_p8 = pnand %p2651_p7, %p2648_p6 }
  0x79   :  { %2656 = shalt.err (!%p2653_p8)
}
  0x7a   :  { %s2657_s6 = scalar_lea.vmem %s106_s28, 1024  ;;  %p2662_p10 = scmp.lt.s32.totalorder %s106_s28, %s106_s28 }
  0x7b   :  { %p2658_p9 = scmp.ne.s32.totalorder %s106_s28, %s2657_s6  ;;  %p2663_p11 = scmp.lt.s32.totalorder %s2657_s6, %s2657_s6 }
  0x7d   :  { %p2664_p12 = por %p2663_p11, %p2662_p10 }
  0x7f   :  { %p2665_p13 = pnand %p2664_p12, %p2658_p9 }
  0x81   :  { %2668 = shalt.err (!%p2665_p13)
}
  0x82   :  { %111 = dma.hbm_to_vmem [thread:$0]  %s3537_s8, 1024, %s106_s28, [#allocation14], %s3551_s2, %s3551_s2, %s2753_s17  }
  0x83   :  { %s2669_s27 = scalar_lea.hbm %s3539_s10, 2048 }
  0x84   :  { %p2670_p0 = scmp.ne.s32.totalorder %s3539_s10, %s2669_s27  ;;  %p2673_p1 = scmp.lt.u32.totalorder %s2669_s27, %s3539_s10 }
  0x86   :  { %p2675_p2 = pnand %p2673_p1, %p2670_p0 }
  0x88   :  { %2678 = shalt.err (!%p2675_p2)
}
  0x89   :  { %s2679_s24 = scalar_lea.vmem %s130_s30, 2048  ;;  %p2684_p4 = scmp.lt.s32.totalorder %s130_s30, %s130_s30 }
  0x8a   :  { %p2680_p3 = scmp.ne.s32.totalorder %s130_s30, %s2679_s24  ;;  %p2685_p5 = scmp.lt.s32.totalorder %s2679_s24, %s2679_s24 }
  0x8c   :  { %p2686_p6 = por %p2685_p5, %p2684_p4 }
  0x8e   :  { %p2687_p7 = pnand %p2686_p6, %p2680_p3 }
  0x90   :  { %2690 = shalt.err (!%p2687_p7)
}
  0x91   :  { %135 = dma.hbm_to_vmem [thread:$0]  %s3539_s10, 2048, %s130_s30, [#allocation17], %s3551_s2, %s3551_s2, %s2753_s17  }
  0x92   :  { %2735 = dma.done.wait [#allocation6], 16  }
  0x93   :  { %2736 = vsyncadd [#allocation6], 4294967280 }
  0x94   :  { %2737 = dma.done.wait [#allocation7], 16  }
  0x95   :  { %2738 = vsyncadd [#allocation7], 4294967280 }
  0x96   :  { %2739 = dma.done.wait [#allocation4], 512  }
  0x97   :  { %2740 = vsyncadd [#allocation4], 4294966784 }
  0x98   :  { %2741 = dma.done.wait [#allocation11], 2048  }
  0x99   :  { %2742 = vsyncadd [#allocation11], 4294965248 }
  0x9a   :  { %2743 = dma.done.wait [#allocation14], 2048  }
  0x9b   :  { %2744 = vsyncadd [#allocation14], 4294965248 }
  0x9c   :  { %2745 = dma.done.wait [#allocation17], 4096  }
  0x9d   :  { %2746 = vsyncadd [#allocation17], 4294963200 }
  0x9e   :  { %171 = sfence }
  0x9f   :  { %v2371_v0 = vld [vmem:[#allocation12] sm:$0xff]   ;;  %v2764_v1 = vmov 0.0   ;;  %v2372_v2 = vld [vmem:[#allocation12 + $0x8] sm:$0xff]   ;;  %vm2765_vm0 = vmmov 0   ;;  %v174_v5 = vlaneseq  ;;  %v2373_v6 = vld [vmem:[#allocation12 + $0x10] sm:$0xff]   ;;  %s2997_s10 = sld [smem:[#allocation3]] }
  0xa0   :  { %2234 = vmatprep.subr.bf16.mxu1 %v2764_v1  ;;  %2206 = vmatprep.subr.bf16.mxu0 %v2764_v1  ;;  %v2374_v3 = vld [vmem:[#allocation10] sm:$0xff]   ;;  %v2376_v4 = vld [vmem:[#allocation10 + $0x8] sm:$0xff]   ;;  %v2378_v7 = vld [vmem:[#allocation10 + $0x10] sm:$0xff]   ;;  %s3078_s22 = sld [smem:[#allocation3 + $0x1]] }
  0xa1   :  { %2235 = vmatpush3.bf16.msra.mxu1 %v2371_v0  ;;  %2250 = vmatprep.mubr.msk.bf16.mxu1 %vm2765_vm0, %v2764_v1  ;;  %v2991_v8 = vshrl.u32 %v174_v5, 7  ;;  %v2375_v9 = vld [vmem:[#allocation12 + $0x18] sm:$0xff]   ;;  %v2377_v10 = vld [vmem:[#allocation12 + $0x20] sm:$0xff]   ;;  %v2379_v24 = vld [vmem:[#allocation12 + $0x28] sm:$0xff]  }
  0xa2   :  { %2236 = vmatprep.subr.bf16.mxu1 %v2764_v1  ;;  %2222 = vmatprep.mubr.msk.bf16.mxu0 %vm2765_vm0, %v2764_v1  ;;  %v2380_v11 = vld [vmem:[#allocation10 + $0x18] sm:$0xff]   ;;  %v173_v17 = vld [vmem:[%s3532_s3] sm:$0xff]  ;;  %v2384_v34 = vld [vmem:[#allocation10 + $0x28] sm:$0xff]  }
  0xa3   :  { %2207 = vmatpush3.bf16.msra.mxu0 %v2374_v3  ;;  %v193_v12 = vsub.s32 0, %v2991_v8  ;;  %v211_v13 = vsub.s32 1, %v2991_v8  ;;  %v229_v14 = vsub.s32 2, %v2991_v8  ;;  %v247_v15 = vsub.s32 3, %v2991_v8  ;;  %v2382_v21 = vld [vmem:[#allocation10 + $0x20] sm:$0xff]   ;;  %v2381_v36 = vld [vmem:[#allocation12 + $0x30] sm:$0xff]  }
  0xa4   :  { %2208 = vmatprep.subr.bf16.mxu0 %v2764_v1  ;;  %v265_v16 = vsub.s32 4, %v2991_v8  ;;  %v283_v18 = vsub.s32 5, %v2991_v8  ;;  %v301_v19 = vsub.s32 6, %v2991_v8  ;;  %v319_v20 = vsub.s32 7, %v2991_v8  ;;  %v2385_v43 = vld [vmem:[#allocation10 + $0x30] sm:$0xff]   ;;  %v2383_v48 = vld [vmem:[#allocation12 + $0x38] sm:$0xff]  }
  0xa5   :  { %2237 = vmatpush3.bf16.msra.mxu1 %v2372_v2  ;;  %v3011_v22 = vadd.s32 8, %v2991_v8  ;;  %v3014_v23 = vadd.s32 16, %v2991_v8  ;;  %v3017_v25 = vrot.slane %v173_v17, %v193_v12  ;;  %v3020_v26 = vrot.slane %v173_v17, %v211_v13  ;;  %s198_s3 = sadd.s32 1, %s2997_s10  ;;  %s216_s30 = sadd.s32 2, %s2997_s10  ;;  %v2386_v55 = vld [vmem:[#allocation10 + $0x38] sm:$0xff]   ;;  %v179_v56 = vld [vmem:[#allocation9] sm:$0xff] }
  0xa6   :  { %2238 = vmatprep.subr.bf16.mxu1 %v2764_v1  ;;  %v3022_v27 = vrot.slane %v173_v17, %v229_v14  ;;  %v3024_v28 = vrot.slane %v173_v17, %v247_v15  ;;  %v3026_v29 = vrot.slane %v173_v17, %v265_v16  ;;  %v3029_v30 = vstv %s2997_s10  ;;  %s234_s5 = sadd.s32 3, %s2997_s10  ;;  %s252_s7 = sadd.s32 4, %s2997_s10  ;;  %v3094_v57 = vld [vmem:[#allocation9 + $0x8] sm:$0xff] }
  0xa7   :  { %2209 = vmatpush3.bf16.msra.mxu0 %v2376_v4  ;;  %v3033_v31 = vrot.slane %v173_v17, %v283_v18  ;;  %v3035_v32 = vrot.slane %v173_v17, %v301_v19  ;;  %v3037_v33 = vrot.slane %v173_v17, %v319_v20  ;;  %vm182_vm1 = vcmp.eq.s32.totalorder %v2991_v8, %v3029_v30  ;;  %s270_s9 = sadd.s32 5, %s2997_s10  ;;  %s288_s19 = sadd.s32 6, %s2997_s10  ;;  %v2388_v19 = vld [vmem:[#allocation13 + $0x8] sm:$0xff]  }
  0xa8   :  { %2210 = vmatprep.subr.bf16.mxu0 %v2764_v1  ;;  %vm183_vm2 = vcmp.eq.s32.totalorder %v3011_v22, %v3029_v30  ;;  %vm184_vm3 = vcmp.eq.s32.totalorder %v3014_v23, %v3029_v30  ;;  %v3045_v35 = vstv %s198_s3  ;;  %v195_v37 = vsel %vm182_vm1, %v3017_v25, 0.0  ;;  %s306_s20 = sadd.s32 7, %s2997_s10  ;;  %s327_s6 = sadd.s32 8, %s2997_s10 }
  0xa9   :  { %2239 = vmatpush3.bf16.msra.mxu1 %v2373_v6  ;;  %v196_v38 = vsel %vm183_vm2, %v3017_v25, 0.0  ;;  %v3052_v39 = vsel %vm184_vm3, %v3017_v25, 0.0  ;;  %vm200_vm4 = vcmp.eq.s32.totalorder %v2991_v8, %v3045_v35  ;;  %vm201_vm5 = vcmp.eq.s32.totalorder %v3011_v22, %v3045_v35  ;;  %v2387_v6 = vld [vmem:[#allocation13] sm:$0xff]   ;;  %s367_s0 = sadd.s32 1, %s3078_s22  ;;  %s381_s23 = sadd.s32 2, %s3078_s22 }
  0xaa   :  { %2240 = vmatprep.subr.bf16.mxu1 %v2764_v1  ;;  %v213_v40 = vsel %vm200_vm4, %v3020_v26, %v195_v37  ;;  %v3061_v41 = vstv %s216_s30  ;;  %v3063_v42 = vstv %s234_s5  ;;  %v214_v44 = vsel %vm201_vm5, %v3020_v26, %v196_v38  ;;  %s395_s26 = sadd.s32 3, %s3078_s22  ;;  %s409_s25 = sadd.s32 4, %s3078_s22 }
  0xab   :  { %2211 = vmatpush3.bf16.msra.mxu0 %v2378_v7  ;;  %vm218_vm6 = vcmp.eq.s32.totalorder %v2991_v8, %v3061_v41  ;;  %vm219_vm7 = vcmp.eq.s32.totalorder %v3011_v22, %v3061_v41  ;;  %vm236_vm8 = vcmp.eq.s32.totalorder %v2991_v8, %v3063_v42  ;;  %vm237_vm9 = vcmp.eq.s32.totalorder %v3011_v22, %v3063_v42  ;;  %s423_s27 = sadd.s32 5, %s3078_s22  ;;  %s437_s1 = sadd.s32 6, %s3078_s22 }
  0xac   :  { %2212 = vmatprep.subr.bf16.mxu0 %v2764_v1  ;;  %v231_v45 = vsel %vm218_vm6, %v3022_v27, %v213_v40  ;;  %v232_v46 = vsel %vm219_vm7, %v3022_v27, %v214_v44  ;;  %v253_v47 = vstv %s252_s7  ;;  %v271_v53 = vstv %s270_s9  ;;  %s451_s21 = sadd.s32 7, %s3078_s22  ;;  %s468_s18 = sadd.s32 8, %s3078_s22  ;;  %v2389_v40 = vld [vmem:[#allocation13 + $0x10] sm:$0xff]  }
  0xad   :  { %2241 = vmatpush3.bf16.msra.mxu1 %v2375_v9  ;;  %v249_v49 = vsel %vm236_vm8, %v3024_v28, %v231_v45  ;;  %v250_v50 = vsel %vm237_vm9, %v3024_v28, %v232_v46  ;;  %vm254_vm10 = vcmp.eq.s32.totalorder %v2991_v8, %v253_v47  ;;  %vm255_vm11 = vcmp.eq.s32.totalorder %v3011_v22, %v253_v47  ;;  %s1963_s5 = sld [smem:[#allocation8]]  ;;  %s2110_s7 = sld [smem:[#allocation8 + $0x1]] }
  0xae   :  { %2242 = vmatprep.subr.bf16.mxu1 %v2764_v1  ;;  %v267_v51 = vsel %vm254_vm10, %v3026_v29, %v249_v49  ;;  %v268_v52 = vsel %vm255_vm11, %v3026_v29, %v250_v50  ;;  %v289_v54 = vstv %s288_s19  ;;  %vm272_vm12 = vcmp.eq.s32.totalorder %v2991_v8, %v271_v53 }
  0xaf   :  { %2213 = vmatpush3.bf16.msra.mxu0 %v2380_v11  ;;  %vm273_vm13 = vcmp.eq.s32.totalorder %v3011_v22, %v271_v53  ;;  %vm290_vm14 = vcmp.eq.s32.totalorder %v2991_v8, %v289_v54  ;;  %vm291_vm15 = vcmp.eq.s32.totalorder %v3011_v22, %v289_v54  ;;  %v285_v58 = vsel %vm272_vm12, %v3033_v31, %v267_v51 }
  0xb0   :  { %2214 = vmatprep.subr.bf16.mxu0 %v2764_v1  ;;  %v286_v59 = vsel %vm273_vm13, %v3033_v31, %v268_v52  ;;  %v307_v60 = vstv %s306_s20  ;;  %vm324_vm1 = vcmp.lt.s32.totalorder %v2991_v8, %v3029_v30  ;;  %v303_v61 = vsel %vm290_vm14, %v3035_v32, %v285_v58 }
  0xb1   :  { %2243 = vmatpush3.bf16.msra.mxu1 %v2377_v10  ;;  %v304_v62 = vsel %vm291_vm15, %v3035_v32, %v286_v59  ;;  %vm308_vm2 = vcmp.eq.s32.totalorder %v2991_v8, %v307_v60  ;;  %vm309_vm3 = vcmp.eq.s32.totalorder %v3011_v22, %v307_v60  ;;  %vm325_vm4 = vcmp.lt.s32.totalorder %v3011_v22, %v3029_v30 }
  0xb2   :  { %2244 = vmatprep.subr.bf16.mxu1 %v2764_v1  ;;  %v321_v63 = vsel %vm308_vm2, %v3037_v33, %v303_v61  ;;  %v322_v0 = vsel %vm309_vm3, %v3037_v33, %v304_v62  ;;  %v328_v2 = vstv %s327_s6  ;;  %vm202_vm7 = vcmp.eq.s32.totalorder %v3014_v23, %v3045_v35 }
  0xb3   :  { %2215 = vmatpush3.bf16.msra.mxu0 %v2382_v21  ;;  %vm329_vm5 = vcmp.lt.s32.totalorder %v2991_v8, %v328_v2  ;;  %vm330_vm6 = vcmp.lt.s32.totalorder %v3011_v22, %v328_v2  ;;  %vm220_vm8 = vcmp.eq.s32.totalorder %v3014_v23, %v3061_v41  ;;  %v215_v5 = vsel %vm202_vm7, %v3020_v26, %v3052_v39 }
  0xb4   :  { %2216 = vmatprep.subr.bf16.mxu0 %v2764_v1  ;;  %v338_v3 = vsel %vm329_vm5, %v321_v63, 0.0  ;;  %v339_v4 = vsel %vm330_vm6, %v322_v0, %v179_v56  ;;  %vm238_vm9 = vcmp.eq.s32.totalorder %v3014_v23, %v3063_v42  ;;  %v233_v10 = vsel %vm220_vm8, %v3022_v27, %v215_v5  ;;  %v2392_v5 = vld [vmem:[#allocation13 + $0x28] sm:$0xff]  }
  0xb5   :  { %2245 = vmatpush3.bf16.msra.mxu1 %v2379_v24  ;;  %v3122_v7 = vsel %vm324_vm1, %v179_v56, %v338_v3  ;;  %v3125_v9 = vsel %vm325_vm4, %v3094_v57, %v339_v4  ;;  %vm256_vm10 = vcmp.eq.s32.totalorder %v3014_v23, %v253_v47  ;;  %v251_v12 = vsel %vm238_vm9, %v3024_v28, %v233_v10  ;;  %v2394_v10 = vld [vmem:[#allocation13 + $0x38] sm:$0xff]  }
  0xb6   :  { %2246 = vmatprep.subr.bf16.mxu1 %v2764_v1  ;;  %v3134_v11 = vpack.c.bf16 %v3125_v9, %v3122_v7  ;;  %vm274_vm11 = vcmp.eq.s32.totalorder %v3014_v23, %v271_v53  ;;  %vm292_vm12 = vcmp.eq.s32.totalorder %v3014_v23, %v289_v54  ;;  %v269_v13 = vsel %vm256_vm10, %v3026_v29, %v251_v12 }
  0xb7   :  { %2217 = vmatpush3.bf16.msra.mxu0 %v2384_v34  ;;  %vm310_vm13 = vcmp.eq.s32.totalorder %v3014_v23, %v307_v60  ;;  %vm326_vm14 = vcmp.lt.s32.totalorder %v3014_v23, %v3029_v30  ;;  %vm331_vm15 = vcmp.lt.s32.totalorder %v3014_v23, %v328_v2  ;;  %v287_v14 = vsel %vm274_vm11, %v3033_v31, %v269_v13 }
  0xb8   :  { %2218 = vmatprep.subr.bf16.mxu0 %v2764_v1  ;;  %v3148_v15 = vstv %s3078_s22  ;;  %v368_v16 = vstv %s367_s0  ;;  %v3150_v17 = vstv %s381_s23  ;;  %v305_v18 = vsel %vm292_vm12, %v3035_v32, %v287_v14  ;;  %vm3199_vm12 = vmneg %vm326_vm14 }
  0xb9   :  { %2247 = vmatpush3.bf16.msra.mxu1 %v2381_v36  ;;  %vm355_vm1 = vcmp.eq.s32.totalorder %v2991_v8, %v3148_v15  ;;  %vm356_vm2 = vcmp.eq.s32.totalorder %v3011_v22, %v3148_v15  ;;  %vm369_vm3 = vcmp.eq.s32.totalorder %v2991_v8, %v368_v16  ;;  %v323_v20 = vsel %vm310_vm13, %v3037_v33, %v305_v18 }
  0xba   :  { %2248 = vmatprep.subr.bf16.mxu1 %v2764_v1  ;;  %v364_v21 = vsel %vm355_vm1, %v3017_v25, 0.0  ;;  %vm383_vm4 = vcmp.eq.s32.totalorder %v2991_v8, %v3150_v17  ;;  %v396_v24 = vstv %s395_s26  ;;  %v3177_v34 = vsel %vm331_vm15, %v323_v20, %v3094_v57 }
  0xbb   :  { %2219 = vmatpush3.bf16.msra.mxu0 %v2385_v43  ;;  %v378_v35 = vsel %vm369_vm3, %v3020_v26, %v364_v21  ;;  %vm397_vm5 = vcmp.eq.s32.totalorder %v2991_v8, %v396_v24  ;;  %v410_v36 = vstv %s409_s25  ;;  %v424_v38 = vstv %s423_s27 }
  0xbc   :  { %2220 = vmatprep.subr.bf16.mxu0 %v2764_v1  ;;  %v392_v37 = vsel %vm383_vm4, %v3022_v27, %v378_v35  ;;  %vm411_vm6 = vcmp.eq.s32.totalorder %v2991_v8, %v410_v36  ;;  %v438_v39 = vstv %s437_s1  ;;  %vm425_vm7 = vcmp.eq.s32.totalorder %v2991_v8, %v424_v38 }
  0xbd   :  { %2249 = vmatpush3.bf16.msra.mxu1 %v2383_v48  ;;  %v406_v41 = vsel %vm397_vm5, %v3024_v28, %v392_v37  ;;  %vm439_vm8 = vcmp.eq.s32.totalorder %v2991_v8, %v438_v39  ;;  %v452_v42 = vstv %s451_s21  ;;  %vm465_vm10 = vcmp.lt.s32.totalorder %v2991_v8, %v3148_v15  ;;  %v352_v48 = vld [vmem:[#allocation9 + $0x10] sm:$0xff] }
  0xbe   :  { %v420_v43 = vsel %vm411_vm6, %v3026_v29, %v406_v41  ;;  %vm453_vm9 = vcmp.eq.s32.totalorder %v2991_v8, %v452_v42  ;;  %v3191_v44 = vstv %s468_s18  ;;  %vm357_vm13 = vcmp.eq.s32.totalorder %v3014_v23, %v3148_v15 }
  0xbf   :  { %2221 = vmatpush3.bf16.msra.mxu0 %v2386_v55  ;;  %v434_v45 = vsel %vm425_vm7, %v3033_v31, %v420_v43  ;;  %vm470_vm11 = vcmp.lt.s32.totalorder %v2991_v8, %v3191_v44  ;;  %v365_v47 = vsel %vm356_vm2, %v3017_v25, 0.0  ;;  %v366_v50 = vsel %vm357_vm13, %v3017_v25, 0.0 }
  0xc0   :  { %2262 = vmatprep.subr.bf16.mxu0 %v2764_v1  ;;  %2251 = vmatmul.mubr.bf16.vlgmr.msra.gmra.mrb[0].mxu1 %v3134_v11  ;;  %v448_v49 = vsel %vm439_vm8, %v3035_v32, %v434_v45  ;;  %vm370_vm15 = vcmp.eq.s32.totalorder %v3011_v22, %v368_v16  ;;  %vm371_vm1 = vcmp.eq.s32.totalorder %v3014_v23, %v368_v16  ;;  %vm2766_vm3 = vmmov 1  }
  0xc1   :  { %2254 = vmatprep.mubr.msk.bf16.mxu1 %vm2765_vm0, %v2764_v1  ;;  %v462_v51 = vsel %vm453_vm9, %v3037_v33, %v448_v49  ;;  %v379_v52 = vsel %vm370_vm15, %v3020_v26, %v365_v47  ;;  %v380_v53 = vsel %vm371_vm1, %v3020_v26, %v366_v50  ;;  %vm384_vm2 = vcmp.eq.s32.totalorder %v3011_v22, %v3150_v17  ;;  %vm3222_vm4 = vmpackc.low %vm2766_vm3, %vm3199_vm12 }
  0xc2   :  { %2223 = vmatmul.mubr.bf16.vlgmr.msra.gmra.mrb[0].mxu0 %v3134_v11  ;;  %v479_v54 = vsel %vm470_vm11, %v462_v51, 0.0  ;;  %vm385_vm5 = vcmp.eq.s32.totalorder %v3014_v23, %v3150_v17  ;;  %v393_v55 = vsel %vm384_vm2, %v3022_v27, %v379_v52  ;;  %vm398_vm6 = vcmp.eq.s32.totalorder %v3011_v22, %v396_v24 }
  0xc3   :  { %2226 = vmatprep.mubr.msk.bf16.mxu0 %vm2765_vm0, %v2764_v1  ;;  %2263 = vmatpush3.bf16.msra.mxu0 %v2387_v6  ;;  %v3233_v26 = vsel %vm465_vm10, %v352_v48, %v479_v54  ;;  %v394_v56 = vsel %vm385_vm5, %v3022_v27, %v380_v53  ;;  %vm399_vm7 = vcmp.eq.s32.totalorder %v3014_v23, %v396_v24  ;;  %v2390_v27 = vld [vmem:[#allocation13 + $0x18] sm:$0xff]   ;;  %v2393_v6 = vld [vmem:[#allocation13 + $0x30] sm:$0xff]  }
  0xc4   :  { %2264 = vmatprep.subr.bf16.mxu0 %v2764_v1  ;;  %v407_v57 = vsel %vm398_vm6, %v3024_v28, %v393_v55  ;;  %v2022_v58 = vpack.c.bf16 %v3233_v26, %v3177_v34  ;;  %v408_v59 = vsel %vm399_vm7, %v3024_v28, %v394_v56  ;;  %vm412_vm8 = vcmp.eq.s32.totalorder %v3011_v22, %v410_v36 }
  0xc5   :  { %vm413_vm9 = vcmp.eq.s32.totalorder %v3014_v23, %v410_v36  ;;  %v421_v8 = vsel %vm412_vm8, %v3026_v29, %v407_v57  ;;  %vm426_vm10 = vcmp.eq.s32.totalorder %v3011_v22, %v424_v38  ;;  %vm427_vm11 = vcmp.eq.s32.totalorder %v3014_v23, %v424_v38 }
  0xc6   :  { %v422_v60 = vsel %vm413_vm9, %v3026_v29, %v408_v59  ;;  %v435_v61 = vsel %vm426_vm10, %v3033_v31, %v421_v8  ;;  %vm440_vm12 = vcmp.eq.s32.totalorder %v3011_v22, %v438_v39  ;;  %vm441_vm13 = vcmp.eq.s32.totalorder %v3014_v23, %v438_v39  ;;  %v353_v29 = vld [vmem:[#allocation9 + $0x18] sm:$0xff] }
  0xc7   :  { %2265 = vmatpush3.bf16.msra.mxu0 %v2388_v19  ;;  %v436_v28 = vsel %vm427_vm11, %v3033_v31, %v422_v60  ;;  %v449_v62 = vsel %vm440_vm12, %v3035_v32, %v435_v61  ;;  %vm454_vm15 = vcmp.eq.s32.totalorder %v3011_v22, %v452_v42  ;;  %vm455_vm1 = vcmp.eq.s32.totalorder %v3014_v23, %v452_v42 }
  0xc8   :  { %2266 = vmatprep.subr.bf16.mxu0 %v2764_v1  ;;  %2255 = vmatmul.mubr.msk.bf16.gmra.mrb[4].mxu1 %vm3222_vm4, %v2022_v58  ;;  %v450_v63 = vsel %vm441_vm13, %v3035_v32, %v436_v28  ;;  %v463_v0 = vsel %vm454_vm15, %v3037_v33, %v449_v62  ;;  %vm466_vm2 = vcmp.lt.s32.totalorder %v3011_v22, %v3148_v15  ;;  %v2391_v32 = vld [vmem:[#allocation13 + $0x20] sm:$0xff]  }
  0xc9   :  { %2258 = vmatprep.mubr.msk.bf16.mxu1 %vm2765_vm0, %v2764_v1  ;;  %v464_v31 = vsel %vm455_vm1, %v3037_v33, %v450_v63  ;;  %vm467_vm5 = vcmp.lt.s32.totalorder %v3014_v23, %v3148_v15  ;;  %vm471_vm6 = vcmp.lt.s32.totalorder %v3011_v22, %v3191_v44  ;;  %vm472_vm7 = vcmp.lt.s32.totalorder %v3014_v23, %v3191_v44 }
  0xca   :  { %2227 = vmatmul.mubr.msk.bf16.gmra.mrb[4].mxu0 %vm3222_vm4, %v2022_v58  ;;  %vm2024_vm8 = vmneg %vm467_vm5  ;;  %v480_v33 = vsel %vm471_vm6, %v463_v0, %v352_v48  ;;  %v3277_v2 = vsel %vm472_vm7, %v464_v31, %v353_v29 }
  0xcb   :  { %2267 = vmatpush3.bf16.msra.mxu0 %v2389_v40  ;;  %2230 = vmatprep.mubr.msk.bf16.mxu0 %vm2765_vm0, %v2764_v1  ;;  %v3280_v3 = vsel %vm466_vm2, %v353_v29, %v480_v33  ;;  %vm3283_vm9 = vmpackc.low %vm2024_vm8, %vm2766_vm3  ;;  %vm964_vm3 = vcmask 1043456  }
  0xcc   :  { %2268 = vmatprep.subr.bf16.mxu0 %v2764_v1  ;;  %v2026_v4 = vpack.c.bf16 %v3277_v2, %v3280_v3 }
  0xcf   :  { %2269 = vmatpush3.bf16.msra.mxu0 %v2390_v27 }
  0xd0   :  { %2270 = vmatprep.subr.bf16.mxu0 %v2764_v1  ;;  %2259 = vmatmul.mubr.msk.bf16.gmra.mrb[8].mxu1 %vm3283_vm9, %v2026_v4 }
  0xd2   :  { %2231 = vmatmul.mubr.msk.bf16.gmra.mrb[8].mxu0 %vm3283_vm9, %v2026_v4 }
  0xd3   :  { %2271 = vmatpush3.bf16.msra.mxu0 %v2391_v32  ;;  %2278 = vmatprep.mubr.msk.bf16.mxu0 %vm2765_vm0, %v2764_v1 }
  0xd4   :  { %2272 = vmatprep.subr.bf16.mxu0 %v2764_v1 }
  0xd7   :  { %2273 = vmatpush3.bf16.msra.mxu0 %v2392_v5  ;;  %v2060_v5 = vld [vmem:[%s3533_s4] ss:$0 sm:$0xff] }
  0xd8   :  { %2274 = vmatprep.subr.bf16.mxu0 %v2764_v1 }
  0xdb   :  { %2275 = vmatpush3.bf16.msra.mxu0 %v2393_v6 }
  0xdc   :  { %2276 = vmatprep.subr.bf16.mxu0 %v2764_v1 }
  0xdf   :  { %2277 = vmatpush3.bf16.msra.mxu0 %v2394_v10 }
  0xe2   :  { %2279 = vmatmul.mubr.bf16.vlgmr.msra.gmra.mrb[12].mxu0 %v3134_v11 }
  0xe3   :  { %2282 = vmatprep.mubr.msk.bf16.mxu0 %vm2765_vm0, %v2764_v1 }
  0xea   :  { %2283 = vmatmul.mubr.msk.bf16.gmra.mrb[16].mxu0 %vm3222_vm4, %v2022_v58  ;;  %vm922_vm4 = vcmask 195584  }
  0xeb   :  { %2286 = vmatprep.mubr.msk.bf16.mxu0 %vm2765_vm0, %v2764_v1 }
  0xf2   :  { %2287 = vmatmul.mubr.msk.bf16.gmra.mrb[20].mxu0 %vm3283_vm9, %v2026_v4 }
 0x193   :  { %v713_v12 = vpop.f32.mrb[0].mxu1 }
 0x194   :  { %v2252_v14 = vpop.f32.mrb[1].mxu1 }
 0x195   :  { %v592_v13 = vpop.f32.mrb[0].mxu0  ;;  %v716_v17 = vpop.f32.mrb[2].mxu1 }
 0x196   :  { %v2224_v16 = vpop.f32.mrb[1].mxu0  ;;  %v859_v19 = vpack.c.bf16 %v716_v17, %v713_v12  ;;  %v2253_v11 = vpop.f32.mrb[3].mxu1 }
 0x197   :  { %v595_v18 = vpop.f32.mrb[2].mxu0 }
 0x198   :  { %v857_v20 = vpack.c.bf16 %v595_v18, %v592_v13  ;;  %v2225_v21 = vpop.f32.mrb[3].mxu0  ;;  %2290 = vmatprep.subr.bf16.mxu1 %v859_v19 }
 0x199   :  { %2291 = vmatpush3.bf16.xpose.msra.mxu1 %v859_v19 }
 0x19a   :  { %2294 = vmatprep.mubr.bf16.mxu1 %v857_v20 }
 0x19b   :  { %v721_v24 = vpop.f32.mrb[4].mxu1 }
 0x19c   :  { %v860_v35 = vpack.c.bf16 %v721_v24, %v721_v24  ;;  %v2256_v36 = vpop.f32.mrb[5].mxu1 }
 0x19d   :  { %v724_v37 = vpop.f32.mrb[6].mxu1  ;;  %v600_v38 = vpop.f32.mrb[4].mxu0  ;;  %v2063_v36 = vld [vmem:[%s3533_s4 + $0x1] ss:$0 sm:$0xff] }
 0x19e   :  { %v2257_v39 = vpop.f32.mrb[7].mxu1  ;;  %2292 = vmatprep.subr.bf16.mxu1 %v860_v35  ;;  %v2228_v40 = vpop.f32.mrb[5].mxu0  ;;  %v858_v43 = vpack.c.bf16 %v600_v38, %v600_v38 }
 0x19f   :  { %v603_v41 = vpop.f32.mrb[6].mxu0 }
 0x1a0   :  { %v2229_v42 = vpop.f32.mrb[7].mxu0 }
 0x1a1   :  { %2293 = vmatpush3.bf16.xpose.msra.mxu1 %v860_v35 }
 0x1a3   :  { %v729_v44 = vpop.f32.mrb[8].mxu1 }
 0x1a4   :  { %v1018_v45 = vpack.c.bf16 %v729_v44, %v724_v37  ;;  %v2260_v46 = vpop.f32.mrb[9].mxu1 }
 0x1a5   :  { %v732_v47 = vpop.f32.mrb[10].mxu1  ;;  %v608_v48 = vpop.f32.mrb[8].mxu0 }
 0x1a6   :  { %v1019_v49 = vpack.c.bf16 %v732_v47, %v732_v47  ;;  %v2261_v50 = vpop.f32.mrb[11].mxu1  ;;  %2306 = vmatprep.subr.bf16.mxu0 %v1018_v45  ;;  %v1016_v51 = vpack.c.bf16 %v608_v48, %v603_v41  ;;  %v2232_v52 = vpop.f32.mrb[9].mxu0 }
 0x1a7   :  { %2307 = vmatpush3.bf16.xpose.msra.mxu0 %v1018_v45  ;;  %v611_v53 = vpop.f32.mrb[10].mxu0 }
 0x1a8   :  { %2295 = vmatmul.mubr.bf16.vlgmr.msra.gmra.mrb[12].mxu1 %v858_v43  ;;  %2308 = vmatprep.subr.bf16.mxu0 %v1019_v49  ;;  %v2233_v54 = vpop.f32.mrb[11].mxu0  ;;  %v1017_v25 = vpack.c.bf16 %v611_v53, %v611_v53 }
 0x1a9   :  { %2310 = vmatprep.mubr.bf16.mxu0 %v1016_v51 }
 0x1af   :  { %2309 = vmatpush3.bf16.xpose.msra.mxu0 %v1019_v49 }
 0x1b5   :  { %v834_v55 = vpop.f32.mrb[12].mxu0 }
 0x1b6   :  { %2311 = vmatmul.mubr.bf16.vlgmr.msra.gmra.mrb[24].mxu0 %v1017_v25  ;;  %v2280_v56 = vpop.f32.mrb[13].mxu0 }
 0x1b7   :  { %v837_v57 = vpop.f32.mrb[14].mxu0 }
 0x1b8   :  { %v861_v58 = vpack.c.bf16 %v837_v57, %v834_v55  ;;  %v2281_v59 = vpop.f32.mrb[15].mxu0 }
 0x1ba   :  { %2298 = vmatprep.subr.bf16.mxu1 %v861_v58 }
 0x1bb   :  { %2299 = vmatpush3.bf16.msra.mxu1 %v861_v58 }
 0x1bd   :  { %v842_v8 = vpop.f32.mrb[16].mxu0 }
 0x1be   :  { %v2284_v60 = vpop.f32.mrb[17].mxu0  ;;  %v862_v63 = vpack.c.bf16 %v842_v8, %v842_v8 }
 0x1bf   :  { %v845_v27 = vpop.f32.mrb[18].mxu0 }
 0x1c0   :  { %v2285_v61 = vpop.f32.mrb[19].mxu0  ;;  %v966_v0 = vsel %vm964_vm3, %v862_v63, 0  ;;  %2350 = vmatprep.subr.msk.bf16.mxu1 %vm964_vm3, %v862_v63 }
 0x1c1   :  { %2301 = vmatpush3.bf16.msra.mxu1 %v966_v0 }
 0x1c2   :  { %2322 = vmatprep.subr.bf16.mxu1 %v2764_v1 }
 0x1c5   :  { %v850_v28 = vpop.f32.mrb[20].mxu0 }
 0x1c6   :  { %v1020_v29 = vpack.c.bf16 %v850_v28, %v845_v27  ;;  %v2288_v62 = vpop.f32.mrb[21].mxu0 }
 0x1c7   :  { %v853_v31 = vpop.f32.mrb[22].mxu0 }
 0x1c8   :  { %2314 = vmatprep.subr.bf16.mxu0 %v1020_v29  ;;  %v2289_v32 = vpop.f32.mrb[23].mxu0  ;;  %v1021_v33 = vpack.c.bf16 %v853_v31, %v853_v31 }
 0x1c9   :  { %2315 = vmatpush3.bf16.msra.mxu0 %v1020_v29 }
 0x1ca   :  { %v1123_v22 = vsel %vm964_vm3, %v1021_v33, 0  ;;  %2351 = vmatprep.subr.msk.bf16.mxu0 %vm964_vm3, %v1021_v33 }
 0x1cd   :  { %2317 = vmatpush3.bf16.msra.mxu0 %v1123_v22 }
 0x27b   :  { %v2296_v4 = vpop.f32.mrb[12].mxu1 }
 0x27c   :  { %v913_v6 = vmul.f32 0.088388346, %v2296_v4  ;;  %v897_v10 = vpop.f32.mrb[13].mxu1 }
 0x27d   :  { %v911_v12 = vmul.f32 0.088388346, %v897_v10  ;;  %v2297_v13 = vpop.f32.mrb[14].mxu1 }
 0x27e   :  { %v900_v14 = vpop.f32.mrb[15].mxu1  ;;  %v921_v16 = vadd.f32 %v2060_v5, %v913_v6 }
 0x27f   :  { %v912_v17 = vmul.f32 0.088388346, %v900_v14  ;;  %v919_v18 = vadd.f32 %v2060_v5, %v911_v12 }
 0x280   :  { %v929_v19 = vsel %vm922_vm4, %v921_v16, -inf }
 0x281   :  { %930 = vmax.xlane.f32.xlu1 %v929_v19  ;;  %v923_v11 = vsel %vm922_vm4, %v919_v18, -inf  ;;  %v920_v20 = vadd.f32 %v2060_v5, %v912_v17 }
 0x282   :  { %924 = vmax.xlane.f32.xlu0 %v923_v11 }
 0x283   :  { %v926_v21 = vsel %vm922_vm4, %v920_v20, -inf }
 0x286   :  { %927 = vmax.xlane.f32.xlu0 %v926_v21 }
 0x289   :  { %v2312_v24 = vpop.f32.mrb[24].mxu0 }
 0x28a   :  { %v1056_v35 = vpop.f32.mrb[25].mxu0  ;;  %v1072_v37 = vmul.f32 0.088388346, %v2312_v24 }
 0x28b   :  { %v1070_v38 = vmul.f32 0.088388346, %v1056_v35  ;;  %v2313_v39 = vpop.f32.mrb[26].mxu0 }
 0x28c   :  { %v1059_v40 = vpop.f32.mrb[27].mxu0  ;;  %v1080_v45 = vadd.f32 %v2063_v36, %v1072_v37  ;;  %v2396_v39 = vld [vmem:[#allocation15 + $0x8] sm:$0xff]  }
 0x28d   :  { %v1071_v41 = vmul.f32 0.088388346, %v1059_v40  ;;  %v1078_v42 = vadd.f32 %v2063_v36, %v1070_v38  ;;  %v2397_v40 = vld [vmem:[#allocation15 + $0x10] sm:$0xff]  }
 0x28e   :  { %v1087_v47 = vsel %vm922_vm4, %v1080_v45, -inf }
 0x28f   :  { %v1081_v43 = vsel %vm922_vm4, %v1078_v42, -inf  ;;  %v1079_v44 = vadd.f32 %v2063_v36, %v1071_v41  ;;  %v2395_v36 = vld [vmem:[#allocation15] sm:$0xff]  }
 0x290   :  { %1082 = vmax.xlane.f32.xlu1 %v1081_v43 }
 0x291   :  { %v1084_v46 = vsel %vm922_vm4, %v1079_v44, -inf }
 0x292   :  { %1085 = vmax.xlane.f32.xlu0 %v1084_v46 }
 0x294   :  { %1088 = vmax.xlane.f32.xlu1 %v1087_v47 }
 0x30e   :  { %v931_v48 = vpop.xlane.xlu1 %930 }
 0x30f   :  { %v934_v49 = vsub.f32 %v921_v16, %v931_v48  ;;  %v925_v50 = vpop.xlane.xlu0 %924 }
 0x310   :  { %v932_v51 = vsub.f32 %v919_v18, %v925_v50  ;;  %v2399_v50 = vld [vmem:[#allocation15 + $0x20] sm:$0xff]  }
 0x311   :  { %v939_v52 = vmul.f32 1.442695, %v934_v49 }
 0x312   :  { %v935_v53 = vmul.f32 1.442695, %v932_v51  ;;  %v2400_v51 = vld [vmem:[#allocation15 + $0x28] sm:$0xff]  }
 0x313   :  { %v928_v54 = vpop.xlane.xlu0 %927 }
 0x314   :  { %2443 = vpow2.f32 %v935_v53  ;;  %v933_v25 = vsub.f32 %v920_v20, %v928_v54  ;;  %v2402_v53 = vld [vmem:[#allocation15 + $0x38] sm:$0xff]  }
 0x315   :  { %2445 = vpow2.f32 %v939_v52  ;;  %v2401_v52 = vld [vmem:[#allocation15 + $0x30] sm:$0xff]  }
 0x316   :  { %v937_v55 = vmul.f32 1.442695, %v933_v25 }
 0x318   :  { %2447 = vpow2.f32 %v937_v55 }
 0x31d   :  { %v1083_v57 = vpop.xlane.xlu1 %1082 }
 0x31e   :  { %v2444_v56 = vpop.eup %2443  ;;  %v1090_v8 = vsub.f32 %v1078_v42, %v1083_v57 }
 0x31f   :  { %v941_v58 = vsel %vm922_vm4, %v2444_v56, 0.0  ;;  %v2446_v59 = vpop.eup %2445  ;;  %v1086_v60 = vpop.xlane.xlu0 %1085 }
 0x320   :  { %942 = vadd.xlane.f32.xlu0 %v941_v58  ;;  %v1093_v61 = vmul.f32 1.442695, %v1090_v8  ;;  %v1091_v28 = vsub.f32 %v1079_v44, %v1086_v60  ;;  %v947_v63 = vsel %vm922_vm4, %v2446_v59, 0.0 }
 0x321   :  { %v1089_v29 = vpop.xlane.xlu1 %1088 }
 0x322   :  { %v2448_v27 = vpop.eup %2447  ;;  %2449 = vpow2.f32 %v1093_v61  ;;  %v1095_v0 = vmul.f32 1.442695, %v1091_v28  ;;  %v1092_v31 = vsub.f32 %v1080_v45, %v1089_v29  ;;  %v2398_v45 = vld [vmem:[#allocation15 + $0x18] sm:$0xff]  }
 0x323   :  { %v944_v62 = vsel %vm922_vm4, %v2448_v27, 0.0 }
 0x324   :  { %945 = vadd.xlane.f32.xlu1 %v944_v62  ;;  %948 = vadd.xlane.f32.xlu0 %v947_v63  ;;  %2451 = vpow2.f32 %v1095_v0  ;;  %v1097_v32 = vmul.f32 1.442695, %v1092_v31 }
 0x326   :  { %2453 = vpow2.f32 %v1097_v32  ;;  %v349_v32 = vsel %vm326_vm14, 0.0, %v3177_v34 }
 0x32c   :  { %v2450_v33 = vpop.eup %2449 }
 0x32d   :  { %v1099_v22 = vsel %vm922_vm4, %v2450_v33, 0.0 }
 0x32e   :  { %v2452_v4 = vpop.eup %2451  ;;  %1100 = vadd.xlane.f32.xlu1 %v1099_v22 }
 0x32f   :  { %v1102_v5 = vsel %vm922_vm4, %v2452_v4, 0.0 }
 0x330   :  { %v2454_v6 = vpop.eup %2453  ;;  %1103 = vadd.xlane.f32.xlu0 %v1102_v5 }
 0x331   :  { %v1105_v10 = vsel %vm922_vm4, %v2454_v6, 0.0 }
 0x332   :  { %1106 = vadd.xlane.f32.xlu1 %v1105_v10 }
 0x3ad   :  { %v943_v12 = vpop.xlane.xlu0 %942 }
 0x3ae   :  { %2455 = vrcp.f32 %v943_v12 }
 0x3b1   :  { %v946_v13 = vpop.xlane.xlu1 %945  ;;  %v949_v14 = vpop.xlane.xlu0 %948 }
 0x3b2   :  { %2457 = vrcp.f32 %v946_v13 }
 0x3b3   :  { %2459 = vrcp.f32 %v949_v14  ;;  %v2403_v14 = vld [vmem:[#allocation16] ss:$8 sps:$4 sm:$0xff]  }
 0x3b8   :  { %v2456_v16 = vpop.eup %2455 }
 0x3b9   :  { %v953_v11 = vmul.f32 %v2456_v16, %v2444_v56  ;;  %v2405_v16 = vld [vmem:[#allocation16 + $0x4] ss:$8 sps:$4 sm:$0xff]  }
 0x3ba   :  { %1495 = vmatprep.subr.bf16.mxu0 %v2405_v16 }
 0x3bb   :  { %v1101_v19 = vpop.xlane.xlu1 %1100 }
 0x3bc   :  { %v2458_v17 = vpop.eup %2457  ;;  %2461 = vrcp.f32 %v1101_v19 }
 0x3bd   :  { %v2460_v18 = vpop.eup %2459  ;;  %v954_v20 = vmul.f32 %v2458_v17, %v2448_v27  ;;  %v1104_v24 = vpop.xlane.xlu0 %1103  ;;  %v2406_v17 = vld [vmem:[#allocation16 + $0x10] ss:$8 sps:$4 sm:$0xff]  }
 0x3be   :  { %v955_v21 = vmul.f32 %v2460_v18, %v2446_v59  ;;  %2463 = vrcp.f32 %v1104_v24 }
 0x3bf   :  { %v956_v35 = vpack.c.bf16 %v954_v20, %v953_v11  ;;  %v1107_v38 = vpop.xlane.xlu1 %1106 }
 0x3c0   :  { %v957_v37 = vpack.c.bf16 %v955_v21, %v955_v21  ;;  %2465 = vrcp.f32 %v1107_v38 }
 0x3c1   :  { %2302 = vmatprep.mubr.msk.bf16.mxu1 %vm922_vm4, %v956_v35 }
 0x3c2   :  { %2303 = vmatmul.mubr.msk.bf16.vlgmr.msra.gmra.mrb[16].mxu1 %vm922_vm4, %v957_v37 }
 0x3c3   :  { %2323 = vmatpush3.bf16.msra.mxu1 %v2395_v36  ;;  %2338 = vmatprep.mubr.msk.bf16.mxu1 %vm2765_vm0, %v2764_v1 }
 0x3c4   :  { %2324 = vmatprep.subr.bf16.mxu1 %v2764_v1 }
 0x3c6   :  { %v2462_v41 = vpop.eup %2461 }
 0x3c7   :  { %2325 = vmatpush3.bf16.msra.mxu1 %v2396_v39  ;;  %v1111_v43 = vmul.f32 %v2462_v41, %v2450_v33 }
 0x3c8   :  { %2326 = vmatprep.subr.bf16.mxu1 %v2764_v1  ;;  %v2464_v42 = vpop.eup %2463 }
 0x3c9   :  { %v1112_v44 = vmul.f32 %v2464_v42, %v2452_v4 }
 0x3ca   :  { %v2466_v46 = vpop.eup %2465 }
 0x3cb   :  { %2327 = vmatpush3.bf16.msra.mxu1 %v2397_v40  ;;  %v1113_v47 = vmul.f32 %v2466_v46, %v2454_v6  ;;  %v1114_v48 = vpack.c.bf16 %v1112_v44, %v1111_v43  ;;  %v2411_v43 = vld [vmem:[#allocation16 + $0x24] ss:$8 sps:$4 sm:$0xff]  }
 0x3cc   :  { %2328 = vmatprep.subr.bf16.mxu1 %v2764_v1 }
 0x3cd   :  { %2318 = vmatprep.mubr.msk.bf16.mxu0 %vm922_vm4, %v1114_v48  ;;  %v1115_v49 = vpack.c.bf16 %v1113_v47, %v1113_v47 }
 0x3cf   :  { %2329 = vmatpush3.bf16.msra.mxu1 %v2398_v45  ;;  %2319 = vmatmul.mubr.msk.bf16.vlgmr.msra.gmra.mrb[28].mxu0 %vm922_vm4, %v1115_v49  ;;  %v2409_v45 = vld [vmem:[#allocation16 + $0x20] ss:$8 sps:$4 sm:$0xff]  }
 0x3d0   :  { %2330 = vmatprep.subr.bf16.mxu1 %v2764_v1  ;;  %1496 = vmatpush1.bf16.msra.mxu0 %v2403_v14 }
 0x3d3   :  { %2331 = vmatpush3.bf16.msra.mxu1 %v2399_v50  ;;  %v2414_v50 = vld [vmem:[#allocation16 + $0x34] ss:$8 sps:$4 sm:$0xff]  }
 0x3d4   :  { %2332 = vmatprep.subr.bf16.mxu1 %v2764_v1 }
 0x3d7   :  { %2333 = vmatpush3.bf16.msra.mxu1 %v2400_v51  ;;  %v2412_v51 = vld [vmem:[#allocation16 + $0x30] ss:$8 sps:$4 sm:$0xff]  }
 0x3d8   :  { %2334 = vmatprep.subr.bf16.mxu1 %v2764_v1 }
 0x3db   :  { %2335 = vmatpush3.bf16.msra.mxu1 %v2401_v52 }
 0x3dc   :  { %2336 = vmatprep.subr.bf16.mxu1 %v2764_v1 }
 0x3df   :  { %2337 = vmatpush3.bf16.msra.mxu1 %v2402_v53  ;;  %v2417_v53 = vld [vmem:[#allocation16 + $0x44] ss:$8 sps:$4 sm:$0xff]  }
 0x495   :  { %v2304_v54 = vpop.f32.mrb[16].mxu1 }
 0x496   :  { %v1002_v25 = vpop.f32.mrb[17].mxu1 }
 0x497   :  { %v2305_v55 = vpop.f32.mrb[18].mxu1 }
 0x498   :  { %v1005_v56 = vpop.f32.mrb[19].mxu1  ;;  %v2418_v55 = vld [vmem:[#allocation16 + $0x50] ss:$8 sps:$4 sm:$0xff]  }
 0x499   :  { %v1189_v57 = vpack.c.bf16 %v1005_v56, %v1002_v25  ;;  %v2420_v25 = vld [vmem:[#allocation16 + $0x54] ss:$8 sps:$4 sm:$0xff]   ;;  %v2423_v56 = vld [vmem:[#allocation16 + $0x64] ss:$8 sps:$4 sm:$0xff]  }
 0x49b   :  { %2339 = vmatmul.mubr.bf16.vlgmr.msra.gmra.mrb[20].mxu1 %v1189_v57  ;;  %v2421_v57 = vld [vmem:[#allocation16 + $0x60] ss:$8 sps:$4 sm:$0xff]  }
 0x49c   :  { %2342 = vmatprep.mubr.msk.bf16.mxu1 %vm2765_vm0, %v2764_v1 }
 0x4a2   :  { %v2320_v58 = vpop.f32.mrb[28].mxu0 }
 0x4a3   :  { %v1159_v59 = vpop.f32.mrb[29].mxu0 }
 0x4a4   :  { %v1190_v8 = vpack.c.bf16 %v1159_v59, %v2304_v54  ;;  %v2321_v60 = vpop.f32.mrb[30].mxu0  ;;  %v2415_v54 = vld [vmem:[#allocation16 + $0x40] ss:$8 sps:$4 sm:$0xff]   ;;  %v2424_v59 = vld [vmem:[#allocation16 + $0x70] ss:$8 sps:$4 sm:$0xff]  }
 0x4a5   :  { %v1162_v27 = vpop.f32.mrb[31].mxu0 }
 0x4a6   :  { %v1191_v61 = vpack.c.bf16 %v2320_v58, %v1162_v27  ;;  %2343 = vmatmul.mubr.bf16.gmra.mrb[24].mxu1 %v1190_v8  ;;  %v2426_v58 = vld [vmem:[#allocation16 + $0x74] ss:$8 sps:$4 sm:$0xff]   ;;  %v2767_v8 = vmov 0  }
 0x4a7   :  { %2346 = vmatprep.mubr.msk.bf16.mxu1 %vm2765_vm0, %v2764_v1  ;;  %1527 = vmatprep.mubr.bf16.mxu0 %v2767_v8 }
 0x4ae   :  { %2347 = vmatmul.mubr.bf16.gmra.mrb[28].mxu1 %v1191_v61 }
 0x56e   :  { %v1274_v28 = vpop.f32.mrb[20].mxu1 }
 0x56f   :  { %v1297_v29 = vadd.f32 %v1274_v28, %v3122_v7  ;;  %v2340_v62 = vpop.f32.mrb[21].mxu1 }
 0x570   :  { %v1277_v63 = vpop.f32.mrb[22].mxu1 }
 0x571   :  { %v1298_v0 = vadd.f32 %v1277_v63, %v3125_v9  ;;  %1305 = vadd.xlane.f32.xlu0 %v1297_v29  ;;  %v2341_v31 = vpop.f32.mrb[23].mxu1  ;;  %v490_v9 = vsel %vm467_vm5, 0.0, %v3277_v2 }
 0x573   :  { %1307 = vadd.xlane.f32.xlu1 %v1298_v0 }
 0x579   :  { %v1282_v33 = vpop.f32.mrb[24].mxu1 }
 0x57a   :  { %v1299_v22 = vadd.f32 %v1282_v33, %v349_v32  ;;  %v2344_v4 = vpop.f32.mrb[25].mxu1  ;;  %v2074_v33 = vld [vmem:[%s3540_s11] ss:$0 sm:$0xff] }
 0x57b   :  { %v1285_v1 = vpop.f32.mrb[26].mxu1 }
 0x57c   :  { %v1300_v5 = vadd.f32 %v1285_v1, %v3233_v26  ;;  %1309 = vadd.xlane.f32.xlu0 %v1299_v22  ;;  %v2345_v7 = vpop.f32.mrb[27].mxu1  ;;  %v2408_v26 = vld [vmem:[#allocation16 + $0x14] ss:$8 sps:$4 sm:$0xff]  }
 0x57d   :  { %1497 = vmatprep.subr.bf16.mxu0 %v2408_v26 }
 0x57e   :  { %1311 = vadd.xlane.f32.xlu1 %v1300_v5  ;;  %1498 = vmatpush1.bf16.msra.mxu0 %v2406_v17 }
 0x57f   :  { %1499 = vmatprep.subr.bf16.mxu0 %v2411_v43 }
 0x581   :  { %v1290_v6 = vpop.f32.mrb[28].mxu1 }
 0x582   :  { %v1301_v10 = vadd.f32 %v1290_v6, %v3280_v3  ;;  %v2348_v12 = vpop.f32.mrb[29].mxu1  ;;  %1500 = vmatpush1.bf16.msra.mxu0 %v2409_v45  ;;  %v2427_v45 = vld [vmem:[#allocation18 + $0x40] sm:$0xff]  }
 0x583   :  { %v1293_v30 = vpop.f32.mrb[30].mxu1  ;;  %1501 = vmatprep.subr.bf16.mxu0 %v2414_v50  ;;  %2172 = vmatprep.subr.bf16.mxu1 %v2427_v45  ;;  %v2432_v50 = vld [vmem:[#allocation18 + $0x10] sm:$0xff]  }
 0x584   :  { %v1302_v34 = vadd.f32 %v1293_v30, %v490_v9  ;;  %1313 = vadd.xlane.f32.xlu0 %v1301_v10  ;;  %v2349_v13 = vpop.f32.mrb[31].mxu1 }
 0x586   :  { %1315 = vadd.xlane.f32.xlu1 %v1302_v34  ;;  %1502 = vmatpush1.bf16.msra.mxu0 %v2412_v51  ;;  %v2433_v51 = vld [vmem:[#allocation18 + $0x58] sm:$0xff]  }
 0x587   :  { %1503 = vmatprep.subr.bf16.mxu0 %v2417_v53  ;;  %v2435_v53 = vld [vmem:[#allocation18 + $0x60] sm:$0xff]  }
 0x58a   :  { %1504 = vmatpush1.bf16.msra.mxu0 %v2415_v54  ;;  %v2436_v54 = vld [vmem:[#allocation18 + $0x20] sm:$0xff]  }
 0x58b   :  { %1505 = vmatprep.subr.bf16.mxu0 %v2420_v25  ;;  %v2437_v25 = vld [vmem:[#allocation18 + $0x68] sm:$0xff]  }
 0x58e   :  { %1506 = vmatpush1.bf16.msra.mxu0 %v2418_v55  ;;  %v2438_v55 = vld [vmem:[#allocation18 + $0x28] sm:$0xff]  }
 0x58f   :  { %1507 = vmatprep.subr.bf16.mxu0 %v2423_v56  ;;  %v2439_v56 = vld [vmem:[#allocation18 + $0x70] sm:$0xff]  }
 0x592   :  { %1508 = vmatpush1.bf16.msra.mxu0 %v2421_v57  ;;  %v2440_v57 = vld [vmem:[#allocation18 + $0x30] sm:$0xff]  }
 0x593   :  { %1509 = vmatprep.subr.bf16.mxu0 %v2426_v58  ;;  %v2441_v58 = vld [vmem:[#allocation18 + $0x78] sm:$0xff]  }
 0x596   :  { %1510 = vmatpush1.bf16.msra.mxu0 %v2424_v59  ;;  %v2442_v59 = vld [vmem:[#allocation18 + $0x38] sm:$0xff]  }
 0x5fe   :  { %v1306_v18 = vpop.xlane.xlu0 %1305 }
 0x5ff   :  { %v1318_v19 = vmul.f32 0.0078125, %v1306_v18 }
 0x600   :  { %v1308_v23 = vpop.xlane.xlu1 %1307 }
 0x601   :  { %v3355_v15 = vsub.f32 %v1297_v29, %v1318_v19  ;;  %v1319_v2 = vmul.f32 0.0078125, %v1308_v23 }
 0x603   :  { %v3357_v3 = vsub.f32 %v1298_v0, %v1319_v2  ;;  %v1330_v11 = vmul.f32 %v3355_v15, %v3355_v15 }
 0x605   :  { %1336 = vadd.xlane.f32.xlu0 %v1330_v11  ;;  %v1331_v20 = vmul.f32 %v3357_v3, %v3357_v3 }
 0x607   :  { %1338 = vadd.xlane.f32.xlu1 %v1331_v20 }
 0x609   :  { %v1310_v21 = vpop.xlane.xlu0 %1309 }
 0x60a   :  { %v1320_v24 = vmul.f32 0.0078125, %v1310_v21 }
 0x60b   :  { %v1312_v35 = vpop.xlane.xlu1 %1311 }
 0x60c   :  { %v3363_v36 = vsub.f32 %v1299_v22, %v1320_v24  ;;  %v1321_v37 = vmul.f32 0.0078125, %v1312_v35 }
 0x60e   :  { %v3365_v38 = vsub.f32 %v1300_v5, %v1321_v37  ;;  %v1332_v39 = vmul.f32 %v3363_v36, %v3363_v36 }
 0x610   :  { %1340 = vadd.xlane.f32.xlu0 %v1332_v39  ;;  %v1333_v40 = vmul.f32 %v3365_v38, %v3365_v38 }
 0x611   :  { %v1314_v41 = vpop.xlane.xlu0 %1313 }
 0x612   :  { %v1322_v42 = vmul.f32 0.0078125, %v1314_v41  ;;  %1342 = vadd.xlane.f32.xlu1 %v1333_v40 }
 0x613   :  { %v1316_v44 = vpop.xlane.xlu1 %1315 }
 0x614   :  { %v3371_v46 = vsub.f32 %v1301_v10, %v1322_v42  ;;  %v1323_v47 = vmul.f32 0.0078125, %v1316_v44  ;;  %v2075_v10 = vld [vmem:[%s3541_s12] ss:$0 sm:$0xff] }
 0x616   :  { %v3373_v48 = vsub.f32 %v1302_v34, %v1323_v47  ;;  %v1334_v49 = vmul.f32 %v3371_v46, %v3371_v46  ;;  %v2428_v47 = vld [vmem:[#allocation18] sm:$0xff]  }
 0x617   :  { %2173 = vmatpush3.bf16.msra.mxu1 %v2428_v47 }
 0x618   :  { %1344 = vadd.xlane.f32.xlu0 %v1334_v49  ;;  %v1335_v52 = vmul.f32 %v3373_v48, %v3373_v48  ;;  %v2430_v49 = vld [vmem:[#allocation18 + $0x8] sm:$0xff]  }
 0x61a   :  { %1346 = vadd.xlane.f32.xlu1 %v1335_v52  ;;  %v2434_v52 = vld [vmem:[#allocation18 + $0x18] sm:$0xff]  }
 0x692   :  { %v1337_v60 = vpop.xlane.xlu0 %1336 }
 0x693   :  { %v1348_v27 = vmul.f32 0.0078125, %v1337_v60 }
 0x694   :  { %v1339_v61 = vpop.xlane.xlu1 %1338 }
 0x695   :  { %v1354_v28 = vadd.f32 1e-05, %v1348_v27  ;;  %v1349_v29 = vmul.f32 0.0078125, %v1339_v61 }
 0x697   :  { %2467 = vrsqrt.f32 %v1354_v28  ;;  %v1355_v62 = vadd.f32 1e-05, %v1349_v29 }
 0x699   :  { %2469 = vrsqrt.f32 %v1355_v62 }
 0x69d   :  { %v1341_v63 = vpop.xlane.xlu0 %1340 }
 0x69e   :  { %v1350_v0 = vmul.f32 0.0078125, %v1341_v63 }
 0x69f   :  { %v1343_v32 = vpop.xlane.xlu1 %1342 }
 0x6a0   :  { %v1356_v4 = vadd.f32 1e-05, %v1350_v0  ;;  %v1351_v1 = vmul.f32 0.0078125, %v1343_v32 }
 0x6a1   :  { %v2468_v31 = vpop.eup %2467 }
 0x6a2   :  { %v1366_v22 = vmul.f32 %v2468_v31, %v3355_v15  ;;  %2471 = vrsqrt.f32 %v1356_v4  ;;  %v1357_v6 = vadd.f32 1e-05, %v1351_v1 }
 0x6a3   :  { %v2470_v5 = vpop.eup %2469 }
 0x6a4   :  { %v1367_v7 = vmul.f32 %v2470_v5, %v3357_v3  ;;  %v1378_v9 = vmul.f32 %v2074_v33, %v1366_v22  ;;  %2473 = vrsqrt.f32 %v1357_v6 }
 0x6a5   :  { %v1345_v30 = vpop.xlane.xlu0 %1344 }
 0x6a6   :  { %v1379_v12 = vmul.f32 %v2074_v33, %v1367_v7  ;;  %v1352_v34 = vmul.f32 0.0078125, %v1345_v30  ;;  %v3387_v13 = vadd.f32 %v2075_v10, %v1378_v9 }
 0x6a7   :  { %v1347_v16 = vpop.xlane.xlu1 %1346 }
 0x6a8   :  { %v3389_v14 = vadd.f32 %v2075_v10, %v1379_v12  ;;  %v1358_v26 = vadd.f32 1e-05, %v1352_v34  ;;  %v1353_v17 = vmul.f32 0.0078125, %v1347_v16 }
 0x6aa   :  { %v1412_v18 = vpack.c.bf16 %v3389_v14, %v3387_v13  ;;  %2475 = vrsqrt.f32 %v1358_v26  ;;  %v1359_v19 = vadd.f32 1e-05, %v1353_v17 }
 0x6ac   :  { %1528 = vmatmul.mubr.bf16.vlgmr.msra.gmra.mrb[32].mxu0 %v1412_v18  ;;  %v2472_v23 = vpop.eup %2471  ;;  %2477 = vrsqrt.f32 %v1359_v19 }
 0x6ad   :  { %1537 = vmatprep.mubr.bf16.mxu0 %v2767_v8  ;;  %v1368_v15 = vmul.f32 %v2472_v23, %v3363_v36 }
 0x6ae   :  { %v2474_v2 = vpop.eup %2473 }
 0x6af   :  { %v1369_v3 = vmul.f32 %v2474_v2, %v3365_v38  ;;  %v1380_v11 = vmul.f32 %v2074_v33, %v1368_v15 }
 0x6b1   :  { %v1381_v20 = vmul.f32 %v2074_v33, %v1369_v3  ;;  %v3395_v21 = vadd.f32 %v2075_v10, %v1380_v11 }
 0x6b3   :  { %v3397_v24 = vadd.f32 %v2075_v10, %v1381_v20 }
 0x6b4   :  { %v2476_v35 = vpop.eup %2475 }
 0x6b5   :  { %v1413_v37 = vpack.c.bf16 %v3397_v24, %v3395_v21  ;;  %v1370_v39 = vmul.f32 %v2476_v35, %v3371_v46  ;;  %v2429_v46 = vld [vmem:[#allocation18 + $0x48] sm:$0xff]  }
 0x6b6   :  { %v2478_v40 = vpop.eup %2477  ;;  %2174 = vmatprep.subr.bf16.mxu1 %v2429_v46 }
 0x6b7   :  { %1538 = vmatmul.mubr.bf16.gmra.mrb[36].mxu0 %v1413_v37  ;;  %v1371_v41 = vmul.f32 %v2478_v40, %v3373_v48  ;;  %v1382_v36 = vmul.f32 %v2074_v33, %v1370_v39  ;;  %2175 = vmatpush3.bf16.msra.mxu1 %v2430_v49  ;;  %v2431_v48 = vld [vmem:[#allocation18 + $0x50] sm:$0xff]  }
 0x6b8   :  { %1547 = vmatprep.mubr.bf16.mxu0 %v2767_v8  ;;  %2176 = vmatprep.subr.bf16.mxu1 %v2431_v48 }
 0x6b9   :  { %v1383_v42 = vmul.f32 %v2074_v33, %v1371_v41  ;;  %v3403_v38 = vadd.f32 %v2075_v10, %v1382_v36 }
 0x6bb   :  { %v3405_v43 = vadd.f32 %v2075_v10, %v1383_v42  ;;  %2177 = vmatpush3.bf16.msra.mxu1 %v2432_v50 }
 0x6bc   :  { %2178 = vmatprep.subr.bf16.mxu1 %v2433_v51 }
 0x6bd   :  { %v1414_v44 = vpack.c.bf16 %v3405_v43, %v3403_v38 }
 0x6bf   :  { %1548 = vmatmul.mubr.bf16.gmra.mrb[40].mxu0 %v1414_v44  ;;  %2179 = vmatpush3.bf16.msra.mxu1 %v2434_v52 }
 0x6c0   :  { %2180 = vmatprep.subr.bf16.mxu1 %v2435_v53 }
 0x6c3   :  { %2181 = vmatpush3.bf16.msra.mxu1 %v2436_v54 }
 0x6c4   :  { %2182 = vmatprep.subr.bf16.mxu1 %v2437_v25 }
 0x6c7   :  { %2183 = vmatpush3.bf16.msra.mxu1 %v2438_v55 }
 0x6c8   :  { %2184 = vmatprep.subr.bf16.mxu1 %v2439_v56 }
 0x6cb   :  { %2185 = vmatpush3.bf16.msra.mxu1 %v2440_v57 }
 0x6cc   :  { %2186 = vmatprep.subr.bf16.mxu1 %v2441_v58 }
 0x6cf   :  { %2187 = vmatpush3.bf16.msra.mxu1 %v2442_v59 }
 0x77f   :  { %v3409_v8 = vpop.f32.mrb[32].mxu0 }
 0x780   :  { %v1558_v60 = vmul.f32 %v3409_v8, %v3409_v8  ;;  %v3413_v27 = vpop.f32.mrb[33].mxu0 }
 0x781   :  { %v1559_v61 = vmul.f32 %v3413_v27, %v3413_v27  ;;  %v3417_v28 = vpop.f32.mrb[34].mxu0 }
 0x782   :  { %v1570_v29 = vmul.f32 %v1558_v60, %v3409_v8  ;;  %v1560_v62 = vmul.f32 %v3417_v28, %v3417_v28  ;;  %v3422_v63 = vpop.f32.mrb[35].mxu0 }
 0x783   :  { %v1571_v0 = vmul.f32 %v1559_v61, %v3413_v27  ;;  %v1561_v31 = vmul.f32 %v3422_v63, %v3422_v63 }
 0x784   :  { %v1582_v32 = vmul.f32 0.044715, %v1570_v29  ;;  %v1572_v33 = vmul.f32 %v1560_v62, %v3417_v28 }
 0x785   :  { %v1583_v22 = vmul.f32 0.044715, %v1571_v0  ;;  %v1573_v4 = vmul.f32 %v1561_v31, %v3422_v63 }
 0x786   :  { %v1594_v1 = vadd.f32 %v1582_v32, %v3409_v8  ;;  %v1584_v5 = vmul.f32 0.044715, %v1572_v33 }
 0x787   :  { %v1595_v7 = vadd.f32 %v1583_v22, %v3413_v27  ;;  %v1585_v6 = vmul.f32 0.044715, %v1573_v4 }
 0x788   :  { %v1606_v9 = vmul.f32 0.7978846, %v1594_v1  ;;  %v1596_v10 = vadd.f32 %v1584_v5, %v3417_v28 }
 0x789   :  { %v1607_v12 = vmul.f32 0.7978846, %v1595_v7  ;;  %v1597_v30 = vadd.f32 %v1585_v6, %v3422_v63 }
 0x78a   :  { %2479 = vtanh.f32 %v1606_v9  ;;  %v1608_v34 = vmul.f32 0.7978846, %v1596_v10  ;;  %v3433_v26 = vpop.f32.mrb[36].mxu0 }
 0x78b   :  { %2481 = vtanh.f32 %v1607_v12  ;;  %v1609_v16 = vmul.f32 0.7978846, %v1597_v30  ;;  %v1562_v17 = vmul.f32 %v3433_v26, %v3433_v26  ;;  %v3437_v18 = vpop.f32.mrb[37].mxu0 }
 0x78c   :  { %2483 = vtanh.f32 %v1608_v34  ;;  %v1563_v19 = vmul.f32 %v3437_v18, %v3437_v18  ;;  %v3441_v23 = vpop.f32.mrb[38].mxu0 }
 0x78d   :  { %2485 = vtanh.f32 %v1609_v16  ;;  %v1574_v15 = vmul.f32 %v1562_v17, %v3433_v26  ;;  %v1564_v2 = vmul.f32 %v3441_v23, %v3441_v23  ;;  %v3446_v3 = vpop.f32.mrb[39].mxu0 }
 0x78e   :  { %v1575_v11 = vmul.f32 %v1563_v19, %v3437_v18  ;;  %v1565_v20 = vmul.f32 %v3446_v3, %v3446_v3 }
 0x78f   :  { %v1586_v35 = vmul.f32 0.044715, %v1574_v15  ;;  %v1576_v37 = vmul.f32 %v1564_v2, %v3441_v23 }
 0x790   :  { %v1587_v39 = vmul.f32 0.044715, %v1575_v11  ;;  %v1577_v40 = vmul.f32 %v1565_v20, %v3446_v3 }
 0x791   :  { %v1598_v41 = vadd.f32 %v1586_v35, %v3433_v26  ;;  %v1588_v36 = vmul.f32 0.044715, %v1576_v37 }
 0x792   :  { %v1599_v44 = vadd.f32 %v1587_v39, %v3437_v18  ;;  %v1589_v45 = vmul.f32 0.044715, %v1577_v40  ;;  %v3455_v47 = vpop.f32.mrb[40].mxu0 }
 0x793   :  { %v1610_v48 = vmul.f32 0.7978846, %v1598_v41  ;;  %v1600_v50 = vadd.f32 %v1588_v36, %v3441_v23  ;;  %v1566_v51 = vmul.f32 %v3455_v47, %v3455_v47  ;;  %v3460_v52 = vpop.f32.mrb[41].mxu0 }
 0x794   :  { %v2480_v42 = vpop.eup %2479  ;;  %v1611_v25 = vmul.f32 0.7978846, %v1599_v44  ;;  %v1601_v55 = vadd.f32 %v1589_v45, %v3446_v3  ;;  %v1567_v56 = vmul.f32 %v3460_v52, %v3460_v52  ;;  %v3465_v57 = vpop.f32.mrb[42].mxu0 }
 0x795   :  { %v2482_v46 = vpop.eup %2481  ;;  %v1630_v49 = vadd.f32 1.0, %v2480_v42  ;;  %2487 = vtanh.f32 %v1610_v48  ;;  %v1612_v61 = vmul.f32 0.7978846, %v1600_v50  ;;  %v3467_v29 = vpop.f32.mrb[43].mxu0  ;;  %v1578_v33 = vmul.f32 %v1566_v51, %v3455_v47 }
 0x796   :  { %v2484_v53 = vpop.eup %2483  ;;  %v1631_v54 = vadd.f32 1.0, %v2482_v46  ;;  %2489 = vtanh.f32 %v1611_v25  ;;  %v1613_v31 = vmul.f32 0.7978846, %v1601_v55  ;;  %v1579_v1 = vmul.f32 %v1567_v56, %v3460_v52 }
 0x797   :  { %v2486_v58 = vpop.eup %2485  ;;  %v1642_v59 = vmul.f32 0.5, %v1630_v49  ;;  %v1632_v60 = vadd.f32 1.0, %v2484_v53  ;;  %2491 = vtanh.f32 %v1612_v61  ;;  %v1590_v7 = vmul.f32 0.044715, %v1578_v33 }
 0x798   :  { %v1643_v62 = vmul.f32 0.5, %v1631_v54  ;;  %v1633_v0 = vadd.f32 1.0, %v2486_v58  ;;  %2493 = vtanh.f32 %v1613_v31  ;;  %v1568_v6 = vmul.f32 %v3465_v57, %v3465_v57 }
 0x799   :  { %v1644_v32 = vmul.f32 0.5, %v1632_v60  ;;  %v1654_v22 = vmul.f32 %v1642_v59, %v3409_v8  ;;  %v1569_v9 = vmul.f32 %v3467_v29, %v3467_v29  ;;  %v1591_v30 = vmul.f32 0.044715, %v1579_v1 }
 0x79a   :  { %v1645_v4 = vmul.f32 0.5, %v1633_v0  ;;  %v1655_v10 = vmul.f32 %v1643_v62, %v3413_v27  ;;  %v1602_v8 = vadd.f32 %v1590_v7, %v3455_v47  ;;  %v1580_v16 = vmul.f32 %v1568_v6, %v3465_v57 }
 0x79b   :  { %v1656_v5 = vmul.f32 %v1644_v32, %v3417_v28  ;;  %v1581_v17 = vmul.f32 %v1569_v9, %v3467_v29  ;;  %v1603_v28 = vadd.f32 %v1591_v30, %v3460_v52 }
 0x79c   :  { %v1657_v12 = vmul.f32 %v1645_v4, %v3422_v63  ;;  %v1614_v15 = vmul.f32 0.7978846, %v1602_v8  ;;  %v1592_v2 = vmul.f32 0.044715, %v1580_v16 }
 0x79d   :  { %v1698_v34 = vpack.c.bf16 %v1656_v5, %v1654_v22  ;;  %v1593_v11 = vmul.f32 0.044715, %v1581_v17  ;;  %v1615_v20 = vmul.f32 0.7978846, %v1603_v28 }
 0x79e   :  { %v1699_v19 = vpack.c.bf16 %v1657_v12, %v1655_v10  ;;  %2495 = vtanh.f32 %v1614_v15  ;;  %v1604_v27 = vadd.f32 %v1592_v2, %v3465_v57 }
 0x79f   :  { %v2488_v35 = vpop.eup %2487  ;;  %v1605_v63 = vadd.f32 %v1593_v11, %v3467_v29  ;;  %2497 = vtanh.f32 %v1615_v20 }
 0x7a0   :  { %1832 = vmatprep.mubr.bf16.mxu1 %v1699_v19  ;;  %v2490_v37 = vpop.eup %2489  ;;  %v1634_v39 = vadd.f32 1.0, %v2488_v35  ;;  %v1616_v36 = vmul.f32 0.7978846, %v1604_v27 }
 0x7a1   :  { %1833 = vmatmul.mubr.bf16.vlgmr.msra.gmra.mrb[32].mxu1 %v1698_v34  ;;  %v2492_v40 = vpop.eup %2491  ;;  %v1635_v41 = vadd.f32 1.0, %v2490_v37  ;;  %v1617_v42 = vmul.f32 0.7978846, %v1605_v63 }
 0x7a2   :  { %v2494_v44 = vpop.eup %2493  ;;  %v1646_v45 = vmul.f32 0.5, %v1634_v39  ;;  %v1636_v46 = vadd.f32 1.0, %v2492_v40  ;;  %2499 = vtanh.f32 %v1616_v36 }
 0x7a3   :  { %v1647_v49 = vmul.f32 0.5, %v1635_v41  ;;  %v1637_v48 = vadd.f32 1.0, %v2494_v44  ;;  %2501 = vtanh.f32 %v1617_v42 }
 0x7a4   :  { %v1648_v50 = vmul.f32 0.5, %v1636_v46  ;;  %v1658_v53 = vmul.f32 %v1646_v45, %v3433_v26 }
 0x7a5   :  { %v1649_v51 = vmul.f32 0.5, %v1637_v48  ;;  %v1659_v25 = vmul.f32 %v1647_v49, %v3437_v18 }
 0x7a6   :  { %v1660_v54 = vmul.f32 %v1648_v50, %v3441_v23 }
 0x7a7   :  { %v1661_v55 = vmul.f32 %v1649_v51, %v3446_v3 }
 0x7a8   :  { %v1700_v56 = vpack.c.bf16 %v1660_v54, %v1658_v53  ;;  %v2496_v58 = vpop.eup %2495 }
 0x7a9   :  { %v1701_v59 = vpack.c.bf16 %v1661_v55, %v1659_v25  ;;  %v2498_v60 = vpop.eup %2497  ;;  %v1638_v61 = vadd.f32 1.0, %v2496_v58 }
 0x7aa   :  { %v1639_v62 = vadd.f32 1.0, %v2498_v60 }
 0x7ab   :  { %1840 = vmatprep.mubr.bf16.mxu1 %v1701_v59  ;;  %v1650_v32 = vmul.f32 0.5, %v1638_v61 }
 0x7ac   :  { %1841 = vmatmul.mubr.bf16.gmra.mrb[36].mxu1 %v1700_v56  ;;  %v2500_v0 = vpop.eup %2499  ;;  %v1651_v22 = vmul.f32 0.5, %v1639_v62 }
 0x7ad   :  { %v2502_v31 = vpop.eup %2501  ;;  %v1640_v33 = vadd.f32 1.0, %v2500_v0  ;;  %v1662_v18 = vmul.f32 %v1650_v32, %v3455_v47 }
 0x7ae   :  { %v1641_v26 = vadd.f32 1.0, %v2502_v31  ;;  %v1663_v1 = vmul.f32 %v1651_v22, %v3460_v52 }
 0x7af   :  { %v1652_v4 = vmul.f32 0.5, %v1640_v33 }
 0x7b0   :  { %v1653_v23 = vmul.f32 0.5, %v1641_v26 }
 0x7b1   :  { %v1664_v3 = vmul.f32 %v1652_v4, %v3465_v57 }
 0x7b2   :  { %v1665_v5 = vmul.f32 %v1653_v23, %v3467_v29  ;;  %v2108_v23 = vld [vmem:[%s3542_s13] ss:$0 sm:$0xff]  ;;  %s2768_s13 = smov [#allocation19]  }
 0x7b3   :  { %v1702_v7 = vpack.c.bf16 %v1664_v3, %v1662_v18 }
 0x7b4   :  { %v1703_v6 = vpack.c.bf16 %v1665_v5, %v1663_v1 }
 0x7b6   :  { %1848 = vmatprep.mubr.bf16.mxu1 %v1703_v6  ;;  %v2109_v6 = vld [vmem:[%s3543_s14] ss:$0 sm:$0xff]  ;;  %s1980_s14 = sshll.u32 %s2768_s13, 4  ;;  %s1981_s14 = int_to_ptr.vmem [resolvable:$true] %s1980_s14 }
 0x7b7   :  { %1849 = vmatmul.mubr.bf16.gmra.mrb[40].mxu1 %v1702_v7  ;;  %s2691_s9 = scalar_lea.vmem %s1981_s14, 32  ;;  %p2696_p9 = scmp.lt.s32.totalorder %s1981_s14, %s1981_s14 }
 0x7b8   :  { %p2692_p8 = scmp.ne.s32.totalorder %s1981_s14, %s2691_s9  ;;  %p2697_p10 = scmp.lt.s32.totalorder %s2691_s9, %s2691_s9 }
 0x7ba   :  { %p2698_p11 = por %p2697_p10, %p2696_p9 }
 0x7bc   :  { %p2699_p12 = pnand %p2698_p11, %p2692_p8 }
 0x874   :  { %v2188_v9 = vpop.f32.mrb[32].mxu1 }
 0x875   :  { %v2189_v10 = vpop.f32.mrb[33].mxu1 }
 0x876   :  { %v2190_v12 = vadd.f32 %v2189_v10, %v2188_v9  ;;  %v2191_v30 = vpop.f32.mrb[34].mxu1 }
 0x877   :  { %v2192_v34 = vpop.f32.mrb[35].mxu1 }
 0x878   :  { %v2193_v8 = vadd.f32 %v2192_v34, %v2191_v30  ;;  %v1857_v16 = vadd.f32 %v2190_v12, %v3387_v13 }
 0x87a   :  { %1865 = vadd.xlane.f32.xlu0 %v1857_v16  ;;  %v1858_v47 = vadd.f32 %v2193_v8, %v3389_v14 }
 0x87c   :  { %1867 = vadd.xlane.f32.xlu1 %v1858_v47 }
 0x87f   :  { %v2194_v57 = vpop.f32.mrb[36].mxu1 }
 0x880   :  { %v2195_v52 = vpop.f32.mrb[37].mxu1 }
 0x881   :  { %v2196_v17 = vadd.f32 %v2195_v52, %v2194_v57  ;;  %v2197_v29 = vpop.f32.mrb[38].mxu1 }
 0x882   :  { %v2198_v28 = vpop.f32.mrb[39].mxu1 }
 0x883   :  { %v2199_v19 = vadd.f32 %v2198_v28, %v2197_v29  ;;  %v1859_v15 = vadd.f32 %v2196_v17, %v3395_v21 }
 0x885   :  { %1869 = vadd.xlane.f32.xlu0 %v1859_v15  ;;  %v1860_v2 = vadd.f32 %v2199_v19, %v3397_v24 }
 0x887   :  { %1871 = vadd.xlane.f32.xlu1 %v1860_v2 }
 0x88a   :  { %v2200_v11 = vpop.f32.mrb[40].mxu1 }
 0x88b   :  { %v2201_v20 = vpop.f32.mrb[41].mxu1 }
 0x88c   :  { %v2202_v35 = vadd.f32 %v2201_v20, %v2200_v11  ;;  %v2203_v13 = vpop.f32.mrb[42].mxu1 }
 0x88d   :  { %v2204_v27 = vpop.f32.mrb[43].mxu1 }
 0x88e   :  { %v2205_v63 = vadd.f32 %v2204_v27, %v2203_v13  ;;  %v1861_v14 = vadd.f32 %v2202_v35, %v3403_v38 }
 0x890   :  { %1873 = vadd.xlane.f32.xlu0 %v1861_v14  ;;  %v1862_v37 = vadd.f32 %v2205_v63, %v3405_v43 }
 0x892   :  { %1875 = vadd.xlane.f32.xlu1 %v1862_v37 }
 0x907   :  { %v1866_v39 = vpop.xlane.xlu0 %1865 }
 0x908   :  { %v1877_v40 = vmul.f32 0.0078125, %v1866_v39 }
 0x909   :  { %v1868_v41 = vpop.xlane.xlu1 %1867 }
 0x90a   :  { %v1883_v21 = vsub.f32 %v1857_v16, %v1877_v40  ;;  %v1878_v36 = vmul.f32 0.0078125, %v1868_v41 }
 0x90c   :  { %v1884_v42 = vsub.f32 %v1858_v47, %v1878_v36  ;;  %v1889_v24 = vmul.f32 %v1883_v21, %v1883_v21 }
 0x90e   :  { %1895 = vadd.xlane.f32.xlu0 %v1889_v24  ;;  %v1890_v44 = vmul.f32 %v1884_v42, %v1884_v42 }
 0x910   :  { %1897 = vadd.xlane.f32.xlu1 %v1890_v44 }
 0x912   :  { %v1870_v45 = vpop.xlane.xlu0 %1869 }
 0x913   :  { %v1879_v46 = vmul.f32 0.0078125, %v1870_v45 }
 0x914   :  { %v1872_v49 = vpop.xlane.xlu1 %1871 }
 0x915   :  { %v1885_v48 = vsub.f32 %v1859_v15, %v1879_v46  ;;  %v1880_v50 = vmul.f32 0.0078125, %v1872_v49 }
 0x917   :  { %v1886_v38 = vsub.f32 %v1860_v2, %v1880_v50  ;;  %v1891_v51 = vmul.f32 %v1885_v48, %v1885_v48 }
 0x919   :  { %1899 = vadd.xlane.f32.xlu0 %v1891_v51  ;;  %v1892_v43 = vmul.f32 %v1886_v38, %v1886_v38 }
 0x91b   :  { %1901 = vadd.xlane.f32.xlu1 %v1892_v43 }
 0x91d   :  { %v1874_v53 = vpop.xlane.xlu0 %1873 }
 0x91e   :  { %v1881_v54 = vmul.f32 0.0078125, %v1874_v53 }
 0x91f   :  { %v1876_v25 = vpop.xlane.xlu1 %1875 }
 0x920   :  { %v1887_v55 = vsub.f32 %v1861_v14, %v1881_v54  ;;  %v1882_v56 = vmul.f32 0.0078125, %v1876_v25 }
 0x922   :  { %v1888_v58 = vsub.f32 %v1862_v37, %v1882_v56  ;;  %v1893_v59 = vmul.f32 %v1887_v55, %v1887_v55 }
 0x924   :  { %1903 = vadd.xlane.f32.xlu0 %v1893_v59  ;;  %v1894_v60 = vmul.f32 %v1888_v58, %v1888_v58 }
 0x926   :  { %1905 = vadd.xlane.f32.xlu1 %v1894_v60 }
 0x99b   :  { %v1896_v61 = vpop.xlane.xlu0 %1895 }
 0x99c   :  { %v1907_v62 = vmul.f32 0.0078125, %v1896_v61 }
 0x99d   :  { %v1898_v0 = vpop.xlane.xlu1 %1897 }
 0x99e   :  { %v1913_v31 = vadd.f32 1e-05, %v1907_v62  ;;  %v1908_v32 = vmul.f32 0.0078125, %v1898_v0 }
 0x9a0   :  { %2503 = vrsqrt.f32 %v1913_v31  ;;  %v1914_v33 = vadd.f32 1e-05, %v1908_v32 }
 0x9a2   :  { %2505 = vrsqrt.f32 %v1914_v33 }
 0x9a6   :  { %v1900_v22 = vpop.xlane.xlu0 %1899 }
 0x9a7   :  { %v1909_v26 = vmul.f32 0.0078125, %v1900_v22 }
 0x9a8   :  { %v1902_v18 = vpop.xlane.xlu1 %1901 }
 0x9a9   :  { %v1915_v1 = vadd.f32 1e-05, %v1909_v26  ;;  %v1910_v5 = vmul.f32 0.0078125, %v1902_v18 }
 0x9aa   :  { %v2504_v4 = vpop.eup %2503 }
 0x9ab   :  { %v1925_v3 = vmul.f32 %v2504_v4, %v1883_v21  ;;  %2507 = vrsqrt.f32 %v1915_v1  ;;  %v1916_v12 = vadd.f32 1e-05, %v1910_v5 }
 0x9ac   :  { %v2506_v7 = vpop.eup %2505 }
 0x9ad   :  { %v1937_v9 = vmul.f32 %v2108_v23, %v1925_v3  ;;  %v1926_v10 = vmul.f32 %v2506_v7, %v1884_v42  ;;  %2509 = vrsqrt.f32 %v1916_v12 }
 0x9af   :  { %v1949_v30 = vadd.f32 %v2109_v6, %v1937_v9  ;;  %v1938_v34 = vmul.f32 %v2108_v23, %v1926_v10 }
 0x9b1   :  { %1955 = vst [vmem:[#allocation2] sm:$0xff] %v1949_v30  ;;  %v1950_v8 = vadd.f32 %v2109_v6, %v1938_v34  ;;  %v1904_v16 = vpop.xlane.xlu0 %1903 }
 0x9b2   :  { %v1911_v47 = vmul.f32 0.0078125, %v1904_v16 }
 0x9b3   :  { %1956 = vst [vmem:[#allocation2 + $0x8] sm:$0xff] %v1950_v8  ;;  %v1906_v57 = vpop.xlane.xlu1 %1905 }
 0x9b4   :  { %v1917_v17 = vadd.f32 1e-05, %v1911_v47  ;;  %v1912_v29 = vmul.f32 0.0078125, %v1906_v57 }
 0x9b5   :  { %v2508_v52 = vpop.eup %2507 }
 0x9b6   :  { %v1927_v28 = vmul.f32 %v2508_v52, %v1885_v48  ;;  %2511 = vrsqrt.f32 %v1917_v17  ;;  %v1918_v2 = vadd.f32 1e-05, %v1912_v29 }
 0x9b7   :  { %v2510_v15 = vpop.eup %2509 }
 0x9b8   :  { %v1961_v19 = vld [vmem:[#allocation2] sm:$0x1]  ;;  %v1939_v11 = vmul.f32 %v2108_v23, %v1927_v28  ;;  %v1928_v20 = vmul.f32 %v2510_v15, %v1886_v38  ;;  %2513 = vrsqrt.f32 %v1918_v2 }
 0x9b9   :  { %1962 = vst [vmem:[#allocation19] sm:$0x1] %v1961_v19 }
 0x9ba   :  { %v1951_v35 = vadd.f32 %v2109_v6, %v1939_v11  ;;  %v1940_v13 = vmul.f32 %v2108_v23, %v1928_v20 }
 0x9bc   :  { %1957 = vst [vmem:[#allocation2 + $0x10] sm:$0xff] %v1951_v35  ;;  %v1952_v27 = vadd.f32 %v2109_v6, %v1940_v13 }
 0x9be   :  { %1958 = vst [vmem:[#allocation2 + $0x18] sm:$0xff] %v1952_v27 }
 0x9c0   :  { %v2512_v63 = vpop.eup %2511 }
 0x9c1   :  { %v1929_v14 = vmul.f32 %v2512_v63, %v1887_v55 }
 0x9c2   :  { %v2514_v37 = vpop.eup %2513 }
 0x9c3   :  { %v1941_v39 = vmul.f32 %v2108_v23, %v1929_v14  ;;  %v1930_v40 = vmul.f32 %v2514_v37, %v1888_v58 }
 0x9c5   :  { %v1967_v41 = vld [vmem:[#allocation2 + $0x18] sm:$0x1]  ;;  %v1953_v21 = vadd.f32 %v2109_v6, %v1941_v39  ;;  %v1942_v36 = vmul.f32 %v2108_v23, %v1930_v40 }
 0x9c6   :  { %1968 = vst [vmem:[#allocation19 + $0x1] sm:$0x1] %v1967_v41 }
 0x9c7   :  { %2702 = shalt.err (!%p2699_p12)
}
 0x9c8   :  { %s2703_s20 = scalar_lea.hbm %s3544_s15, 32 }
 0x9c9   :  { %p2704_p13 = scmp.ne.s32.totalorder %s3544_s15, %s2703_s20  ;;  %p2707_p0 = scmp.lt.u32.totalorder %s2703_s20, %s3544_s15 }
 0x9cb   :  { %p2709_p1 = pnand %p2707_p0, %p2704_p13 }
 0x9cd   :  { %2712 = shalt.err (!%p2709_p1)
}
 0x9ce   :  { %1983 = dma.vmem_to_hbm [thread:$0]  %s1981_s14, 32, %s3544_s15, [#allocation5]   ;;  %1959 = vst [vmem:[#allocation2 + $0x20] sm:$0xff] %v1953_v21  ;;  %v1954_v42 = vadd.f32 %v2109_v6, %v1942_v36 }
 0x9cf   :  { %s2769_s1 = smov [#allocation20]   ;;  %s1964_s18 = scalar_lea.vmem [#allocation2], %s1963_s5 }
 0x9d0   :  { %1960 = vst [vmem:[#allocation2 + $0x28] sm:$0xff] %v1954_v42  ;;  %s1990_s21 = sshll.u32 %s2769_s1, 4  ;;  %s2009_s29 = scalar_lea.vmem [#allocation2], %s2110_s7  ;;  %s1991_s21 = int_to_ptr.vmem [resolvable:$true] %s1990_s21 }
 0x9d1   :  { %s2713_s24 = scalar_lea.vmem %s1991_s21, 32  ;;  %p2718_p3 = scmp.lt.s32.totalorder %s1991_s21, %s1991_s21 }
 0x9d2   :  { %p2714_p2 = scmp.ne.s32.totalorder %s1991_s21, %s2713_s24  ;;  %p2719_p4 = scmp.lt.s32.totalorder %s2713_s24, %s2713_s24 }
 0x9d4   :  { %p2720_p5 = por %p2719_p4, %p2718_p3 }
 0x9d6   :  { %p2721_p6 = pnand %p2720_p5, %p2714_p2 }
 0x9d7   :  { %v1965_v24 = vld [vmem:[%s1964_s18] sm:$0x1]  ;;  %v2111_v44 = vld [vmem:[%s2009_s29 + $0x18] sm:$0x1] }
 0x9d8   :  { %1966 = vst [vmem:[#allocation20] sm:$0x1] %v1965_v24  ;;  %1973 = vst [vmem:[#allocation20 + $0x1] sm:$0x1] %v2111_v44 }
 0x9d9   :  { %2724 = shalt.err (!%p2721_p6)
}
 0x9da   :  { %s2725_s28 = scalar_lea.hbm %s3545_s16, 32 }
 0x9db   :  { %p2726_p7 = scmp.ne.s32.totalorder %s3545_s16, %s2725_s28  ;;  %p2729_p8 = scmp.lt.u32.totalorder %s2725_s28, %s3545_s16 }
 0x9dd   :  { %p2731_p9 = pnand %p2729_p8, %p2726_p7 }
 0x9df   :  { %2734 = shalt.err (!%p2731_p9)
}
 0x9e0   :  { %1993 = dma.vmem_to_hbm [thread:$0]  %s1991_s21, 32, %s3545_s16, [#allocation21]  }
 0x9e1   :  { %2747 = dma.done.wait [#allocation5], 32  }
 0x9e2   :  { %2748 = vsyncadd [#allocation5], 4294967264 }
 0x9e3   :  { %2749 = dma.done.wait [#allocation21], 32  }
 0x9e4   :  { %2750 = vsyncadd [#allocation21], 4294967264 }
 0x9e5   :  { %2000 = vsyncpa [#allocation4], 1 }
 0x9e6   :  { %2001 = vsyncpa [#allocation11], 1 }
 0x9e7   :  { %2002 = vsyncpa [#allocation14], 1 }
 0x9e8   :  { %2003 = vsyncpa [#allocation17], 1 }
 0x9e9   :  { %2004 = vsyncpa [#allocation5], 1 }
 0x9ea   :  { %2005 = vsyncpa [#allocation21], 1 }
 0x9eb   :  { %2006 = vsyncpa [#allocation6], 1 }
 0x9ec   :  { %2007 = vsyncpa [#allocation7], 1 }

</bundles_post_ra>
